<compile_context>
chip_gen: v7x
topology: tpu7x:2x2x1
jax: 0.10.0
libtpu: 0.0.40
codegen_flags: <defaults>
</compile_context>

<pallas_src>
import math

import jax
import jax.numpy as jnp
from jax.experimental import pallas as pl
from jax.experimental.pallas import tpu as pltpu


def _round_up(x, m):
    return ((x + m - 1) // m) * m


def _unroll_for(n):
    if n <= 16:
        return n
    for u in (8, 4, 2):
        if n % u == 0:
            return u
    return 1


# ----------------------------------------------------------------------------
# Pallas GRU kernel: one grid step == TT time steps (last block runs `rem`).
# ----------------------------------------------------------------------------
def make_gru_kernel(n_in, B, Hp, TT, n_blk, rem):
    """GRU kernel for `n_in` input streams whose concat is the GRU input.

    B   : padded batch (multiple of 8)
    Hp  : hidden width padded to a multiple of 128 (gate stride on 3*Hp axis)
    TT  : time steps per grid block, rem : valid steps in the last block
    """
    partial_last = (rem != TT)

    def kernel(*args):
        it = iter(args)
        h0_ref = next(it)                              # (B, Hp) f32
        x_refs = [next(it) for _ in range(n_in)]       # (TT*B, D_j) time-major
        wiT_refs = [next(it) for _ in range(n_in)]     # (D_j, 3*Hp) matmul dtype
        whT_ref = next(it)                             # (Hp, 3*Hp) f32
        brz_ref = next(it)                             # (1, 3*Hp) = b_ih + [bh_r|bh_z|0]
        bhn_ref = next(it)                             # (1, Hp)   = bh_n
        y_ref = next(it)                               # (TT*B, Hp)
        hN_ref = next(it)                              # (B, Hp)
        gi_scr = next(it)                              # VMEM (TT*B, 3*Hp) f32
        h_scr = next(it)                               # VMEM (B, Hp) f32

        tb = pl.program_id(0)

        @pl.when(tb == 0)
        def _():
            h_scr[...] = h0_ref[...]

        # Fused (r|z|n) input projection for the whole block: one big MXU
        # matmul per input stream (bf16 inputs by default, f32 accumulation).
        gi = jnp.dot(x_refs[0][...], wiT_refs[0][...],
                     preferred_element_type=jnp.float32)
        for j in range(1, n_in):
            gi = gi + jnp.dot(x_refs[j][...], wiT_refs[j][...],
                              preferred_element_type=jnp.float32)
        gi_scr[...] = gi + brz_ref[...]

        whT = whT_ref[...]      # f32: keep the recurrent matmul in f32
        bh_n = bhn_ref[...]

        def step(s, h):
            row = pl.multiple_of(s * B, 8)
            gi_t = gi_scr[pl.ds(row, B), :]                                 # (B, 3Hp)
            gh_t = jnp.dot(h, whT, preferred_element_type=jnp.float32)      # (B, 3Hp)
            r = jax.nn.sigmoid(gi_t[:, :Hp] + gh_t[:, :Hp])
            z = jax.nn.sigmoid(gi_t[:, Hp:2 * Hp] + gh_t[:, Hp:2 * Hp])
            n = jnp.tanh(gi_t[:, 2 * Hp:] + r * (gh_t[:, 2 * Hp:] + bh_n))
            h_new = n + z * (h - n)
            y_ref[pl.ds(row, B), :] = h_new
            return h_new

        def run(num_steps):
            h_fin = jax.lax.fori_loop(0, num_steps, step, h_scr[...],
                                      unroll=_unroll_for(num_steps))
            h_scr[...] = h_fin
            hN_ref[...] = h_fin

        if partial_last:
            @pl.when(tb != n_blk - 1)
            def _():
                run(TT)

            @pl.when(tb == n_blk - 1)
            def _():
                run(rem)        # static trip count; no per-step masking anywhere
        else:
            run(TT)

    return kernel


# ----------------------------------------------------------------------------
# Host-side layout helpers (time-major flat (T*B, D) activations).
# ----------------------------------------------------------------------------
def to_time_major_flat(x_bt, batch_pad=None):
    """(B, T, D) -> (T*Bp, D) time-major flattened f32, optionally batch-padded."""
    B, T, D = x_bt.shape
    Bp = B if batch_pad is None else batch_pad
    x = x_bt.astype(jnp.float32)
    if Bp != B:
        x = jnp.pad(x, ((0, Bp - B), (0, 0), (0, 0)))
    return jnp.transpose(x, (1, 0, 2)).reshape(T * Bp, D)


def from_time_major_flat(y_flat, B, T):
    """(T*B, H) time-major flattened -> (B, T, H)."""
    H = y_flat.shape[-1]
    return jnp.transpose(y_flat.reshape(T, B, H), (1, 0, 2))


# ----------------------------------------------------------------------------
# Single GRU layer (torch.nn.GRU batch_first semantics).
# ----------------------------------------------------------------------------
def gru_layer(xs_flat, h0, w_ih, w_hh, b_ih, b_hh, *, tt=None,
              matmul_dtype=jnp.bfloat16):
    """GRU whose input at step t is concat_j xs_flat[j][t*B:(t+1)*B].

    xs_flat : list of (T*B, D_j) f32 arrays (time-major flattened)
    h0      : (B, H) f32 initial hidden state
    w_ih    : (3H, sum_j D_j), w_hh : (3H, H), b_ih/b_hh : (3H,) (torch r|z|n)
    returns (y_flat (T*B, H) time-major flattened, final hidden (B, H))
    """
    B0, H = h0.shape
    rows = xs_flat[0].shape[0]
    assert rows % B0 == 0
    T = rows // B0
    dims = [int(x.shape[-1]) for x in xs_flat]
    n_in = len(xs_flat)
    assert w_ih.shape == (3 * H, sum(dims)) and w_hh.shape == (3 * H, H)

    # ---- pad batch to a multiple of 8 (sublane alignment) -------------------
    Bp = _round_up(B0, 8)
    if Bp != B0:
        xs_flat = [jnp.pad(x.reshape(T, B0, -1), ((0, 0), (0, Bp - B0), (0, 0)))
                   .reshape(T * Bp, -1) for x in xs_flat]
        h0 = jnp.pad(h0, ((0, Bp - B0), (0, 0)))

    # ---- pad hidden/gate lane axis to a multiple of 128 ----------------------
    Hp = _round_up(H, 128)
    H3p = 3 * Hp
    x_bytes = jnp.dtype(matmul_dtype).itemsize

    # ---- time tile under a VMEM budget (v7x-safe) ----------------------------
    if tt is None:
        tt = T if T <= 128 else 128

    def _vmem_est(ttv):
        blk = ttv * Bp
        e = 2 * blk * sum(dims) * x_bytes            # input blocks (double-buffered)
        e += 2 * blk * Hp * 4                        # output block (double-buffered)
        e += blk * H3p * 4                           # gi scratch
        e += 2 * Bp * Hp * 4                         # h scratch + h0
        e += 2 * (sum(dims) * H3p * x_bytes + Hp * H3p * 4 + H3p * 4 + Hp * 4)
        return e

    while tt > 8 and _vmem_est(tt) > (32 << 20):
        tt = max(8, tt // 2)

    n_blk = (T + tt - 1) // tt
    T_pad = n_blk * tt
    rem = T - (n_blk - 1) * tt

    xs = [x.astype(matmul_dtype) for x in xs_flat]
    if T_pad != T:
        pad_rows = (T_pad - T) * Bp
        xs = [jnp.pad(x, ((0, pad_rows), (0, 0))) for x in xs]

    # ---- fused, gate-padded weights (torch r|z|n order, gate stride Hp) ------
    wiT_full = jnp.transpose(w_ih)                           # (sumD, 3H)
    whT_full = jnp.transpose(w_hh)                           # (H, 3H)
    wiT_p = jnp.zeros((sum(dims), H3p), matmul_dtype)
    whT_p = jnp.zeros((Hp, H3p), jnp.float32)
    brz = jnp.zeros((1, H3p), jnp.float32)
    for g in range(3):
        wiT_p = wiT_p.at[:, g * Hp:g * Hp + H].set(
            wiT_full[:, g * H:(g + 1) * H].astype(matmul_dtype))
        whT_p = whT_p.at[:H, g * Hp:g * Hp + H].set(
            whT_full[:, g * H:(g + 1) * H].astype(jnp.float32))
        hb = b_hh[g * H:(g + 1) * H] if g < 2 else jnp.zeros((H,), b_hh.dtype)
        brz = brz.at[0, g * Hp:g * Hp + H].set(
            (b_ih[g * H:(g + 1) * H] + hb).astype(jnp.float32))
    bh_n = jnp.zeros((1, Hp), jnp.float32).at[0, :H].set(
        b_hh[2 * H:].astype(jnp.float32))

    wiT_list, off = [], 0
    for d in dims:
        wiT_list.append(wiT_p[off:off + d])
        off += d

    h0_p = jnp.zeros((Bp, Hp), jnp.float32).at[:, :H].set(h0.astype(jnp.float32))

    kernel = make_gru_kernel(n_in=n_in, B=Bp, Hp=Hp, TT=tt, n_blk=n_blk, rem=rem)

    in_specs = (
        [pl.BlockSpec((Bp, Hp), lambda t: (0, 0))]                              # h0
        + [pl.BlockSpec((tt * Bp, d), lambda t: (t, 0)) for d in dims]          # x_j blocks
        + [pl.BlockSpec((d, H3p), lambda t: (0, 0)) for d in dims]              # W_ih^T slices
        + [pl.BlockSpec((Hp, H3p), lambda t: (0, 0)),                           # W_hh^T
           pl.BlockSpec((1, H3p), lambda t: (0, 0)),                            # folded bias
           pl.BlockSpec((1, Hp), lambda t: (0, 0))]                             # b_hh (n gate)
    )
    out_specs = (
        pl.BlockSpec((tt * Bp, Hp), lambda t: (t, 0)),     # outputs, one block / step
        pl.BlockSpec((Bp, Hp), lambda t: (0, 0)),          # final hidden
    )

    y_flat, hN = pl.pallas_call(
        kernel,
        out_shape=(jax.ShapeDtypeStruct((T_pad * Bp, Hp), jnp.float32),
                   jax.ShapeDtypeStruct((Bp, Hp), jnp.float32)),
        grid_spec=pltpu.PrefetchScalarGridSpec(
            num_scalar_prefetch=0,
            grid=(n_blk,),
            in_specs=in_specs,
            out_specs=out_specs,
            scratch_shapes=[pltpu.VMEM((tt * Bp, H3p), jnp.float32),   # gi for block
                            pltpu.VMEM((Bp, Hp), jnp.float32)],        # carried hidden
        ),
        compiler_params=pltpu.CompilerParams(
            dimension_semantics=("arbitrary",),            # recurrence serial in time
            vmem_limit_bytes=48 * 1024 * 1024),
    )(h0_p, *xs, *wiT_list, whT_p, brz, bh_n)

    # ---- strip padding --------------------------------------------------------
    y_flat = y_flat[:T * Bp]
    if Hp != H:
        y_flat = y_flat[:, :H]
        hN = hN[:, :H]
    if Bp != B0:
        y_flat = y_flat.reshape(T, Bp, H)[:, :B0].reshape(T * B0, H)
        hN = hN[:B0]
    return y_flat, hN


# ----------------------------------------------------------------------------
# Hierarchical_Encoder forward (plain-JAX glue around the Pallas GRU layers).
# ----------------------------------------------------------------------------
def hierarchical_encoder_forward(params_list, hidden_sizes, input_feats,
                                 no_global_context=False,
                                 no_regional_context=False,
                                 matmul_dtype=jnp.bfloat16):
    # nn.Dropout(p=opt['encoder_dropout']) -> identity (eval mode).
    B, T, _ = input_feats[0].shape
    for f in input_feats[1:]:
        assert f.shape[1] == T
    Bp = _round_up(B, 8)     # pad batch once; layers operate on padded batch

    feats_flat = [to_time_major_flat(f, batch_pad=Bp) for f in input_feats]

    rnn_out_flat = None
    encoder_hidden = None
    for i in range(len(input_feats)):
        if i:
            if no_global_context:
                encoder_hidden = None
            if no_regional_context:
                xs = [feats_flat[i]]
            else:
                # == torch.cat([rnn_output, input_feats[i]], dim=2), never materialised.
                xs = [rnn_out_flat, feats_flat[i]]
        else:
            xs = [feats_flat[i]]
        if encoder_hidden is None:
            h0 = jnp.zeros((Bp, hidden_sizes[i]), jnp.float32)
        else:
            h0 = encoder_hidden
        rnn_out_flat, encoder_hidden = gru_layer(
            xs, h0, *params_list[i], matmul_dtype=matmul_dtype)

    rnn_output = from_time_major_flat(rnn_out_flat, Bp, T)[:B]
    # torch returns encoder_hidden[-1, :, :]; with num_layers=1 that's (B, H).
    return rnn_output, encoder_hidden[:B]


# ----------------------------------------------------------------------------
# Parameter init (mimics torch.nn.GRU uniform(-1/sqrt(H), 1/sqrt(H))).
# ----------------------------------------------------------------------------
def init_gru_params(key, input_size, hidden_size):
    k = 1.0 / math.sqrt(hidden_size)
    k1, k2, k3, k4 = jax.random.split(key, 4)
    w_ih = jax.random.uniform(k1, (3 * hidden_size, input_size), minval=-k, maxval=k, dtype=jnp.float32)
    w_hh = jax.random.uniform(k2, (3 * hidden_size, hidden_size), minval=-k, maxval=k, dtype=jnp.float32)
    b_ih = jax.random.uniform(k3, (3 * hidden_size,), minval=-k, maxval=k, dtype=jnp.float32)
    b_hh = jax.random.uniform(k4, (3 * hidden_size,), minval=-k, maxval=k, dtype=jnp.float32)
    return (w_ih, w_hh, b_ih, b_hh)


# ----------------------------------------------------------------------------
# Pure-JAX references (lax.scan GRU) for correctness checks.
# ----------------------------------------------------------------------------
def gru_ref(x_bt, h0, w_ih, w_hh, b_ih, b_hh):
    H = h0.shape[-1]
    wiT = jnp.transpose(w_ih)
    whT = jnp.transpose(w_hh)

    def step(h, x):
        gi = x @ wiT + b_ih
        gh = h @ whT + b_hh
        ir, iz, inn = gi[:, :H], gi[:, H:2 * H], gi[:, 2 * H:]
        hr, hz, hn = gh[:, :H], gh[:, H:2 * H], gh[:, 2 * H:]
        r = jax.nn.sigmoid(ir + hr)
        z = jax.nn.sigmoid(iz + hz)
        n = jnp.tanh(inn + r * hn)
        h_new = (1.0 - z) * n + z * h
        return h_new, h_new

    hN, ys = jax.lax.scan(step, h0, jnp.transpose(x_bt, (1, 0, 2)))
    return jnp.transpose(ys, (1, 0, 2)), hN


def hierarchical_ref(params_list, hidden_sizes, input_feats,
                     no_global_context=False, no_regional_context=False):
    rnn_output = None
    encoder_hidden = None
    for i, feat in enumerate(input_feats):
        B = feat.shape[0]
        if i:
            if no_global_context:
                encoder_hidden = None
            inp = feat if no_regional_context else jnp.concatenate([rnn_output, feat], axis=2)
        else:
            inp = feat
        h0 = (jnp.zeros((B, hidden_sizes[i]), jnp.float32)
              if encoder_hidden is None else encoder_hidden)
        rnn_output, encoder_hidden = gru_ref(inp, h0, *params_list[i])
    return rnn_output, encoder_hidden


if __name__ == "__main__":
    # Small shapes consistent with the module: two feature streams.
    B, T = 2, 8
    D0, D1 = 16, 24          # input_size = [D0, D1]
    H = 32                   # hidden_size = [H, H] (hidden of rnn0 seeds rnn1)
    hidden_sizes = [H, H]

    key = jax.random.PRNGKey(0)
    k_x0, k_x1, k_r0, k_r1, k_x2 = jax.random.split(key, 5)

    x0 = jax.random.normal(k_x0, (B, T, D0), dtype=jnp.float32)
    x1 = jax.random.normal(k_x1, (B, T, D1), dtype=jnp.float32)
    input_feats = [x0, x1]

    # rnn0 = GRU(D0, H); rnn1 = GRU(H + D1, H)  (global + regional context enabled)
    params_list = [
        init_gru_params(k_r0, D0, H),
        init_gru_params(k_r1, H + D1, H),
    ]

    # Pure-JAX reference.
    y_ref_out, h_ref_out = hierarchical_ref(params_list, hidden_sizes, input_feats)

    # f32 MXU path: tight correctness check.
    y32, h32 = hierarchical_encoder_forward(params_list, hidden_sizes, input_feats,
                                            matmul_dtype=jnp.float32)
    y32 = jax.block_until_ready(y32)
    h32 = jax.block_until_ready(h32)
    assert y32.shape == (B, T, H)
    assert h32.shape == (B, H)
    assert jnp.allclose(y32, y_ref_out, rtol=1e-4, atol=1e-4)
    assert jnp.allclose(h32, h_ref_out, rtol=1e-4, atol=1e-4)

    # Default bf16 input-projection path: looser sanity tolerance.
    ybf, hbf = hierarchical_encoder_forward(params_list, hidden_sizes, input_feats)
    ybf = jax.block_until_ready(ybf)
    hbf = jax.block_until_ready(hbf)
    assert ybf.shape == (B, T, H)
    assert hbf.shape == (B, H)
    assert jnp.allclose(ybf, y_ref_out, rtol=1e-1, atol=1e-1)
    assert jnp.allclose(hbf, h_ref_out, rtol=1e-1, atol=1e-1)

    # Multi-block time tiling with a partial last block (T=10, tt=4), f32 path.
    T2 = 10
    x2 = jax.random.normal(k_x2, (B, T2, D0), dtype=jnp.float32)
    y2_flat, h2 = gru_layer([to_time_major_flat(x2)],
                            jnp.zeros((B, H), jnp.float32),
                            *params_list[0], tt=4, matmul_dtype=jnp.float32)
    y2 = from_time_major_flat(y2_flat, B, T2)
    y2 = jax.block_until_ready(y2)
    y2_ref, h2_ref = gru_ref(x2, jnp.zeros((B, H), jnp.float32), *params_list[0])
    assert jnp.allclose(y2, y2_ref, rtol=1e-4, atol=1e-4)
    assert jnp.allclose(h2, h2_ref, rtol=1e-4, atol=1e-4)

    print("KERNEL_OK")
</pallas_src>

<mosaic_0001>
module attributes {stable_mosaic.version = 11 : i64} {
  func.func @kernel(%arg0: i32, %arg1: memref<8x128xf32, #tpu.memory_space<vmem>>, %arg2: memref<64x16xf32, #tpu.memory_space<vmem>>, %arg3: memref<16x384xf32, #tpu.memory_space<vmem>>, %arg4: memref<128x384xf32, #tpu.memory_space<vmem>>, %arg5: memref<1x384xf32, #tpu.memory_space<vmem>>, %arg6: memref<1x128xf32, #tpu.memory_space<vmem>>, %arg7: memref<64x128xf32, #tpu.memory_space<vmem>>, %arg8: memref<8x128xf32, #tpu.memory_space<vmem>>, %arg9: memref<64x384xf32, #tpu.memory_space<vmem>>, %arg10: memref<8x128xf32, #tpu.memory_space<vmem>>) attributes {dimension_semantics = [#tpu.dimension_semantics<arbitrary>], iteration_bounds = array<i64: 1>, scalar_prefetch = 0 : i64, scratch_operands = 2 : i64, tpu.core_type = #tpu.core_type<tc>, window_params = [{pipeline_mode = #tpu.pipeline_mode<synchronous>, transform_indices = @transform_0, window_bounds = array<i64: 8, 128>}, {transform_indices = @transform_1, window_bounds = array<i64: 64, 16>}, {pipeline_mode = #tpu.pipeline_mode<synchronous>, transform_indices = @transform_2, window_bounds = array<i64: 16, 384>}, {pipeline_mode = #tpu.pipeline_mode<synchronous>, transform_indices = @transform_3, window_bounds = array<i64: 128, 384>}, {pipeline_mode = #tpu.pipeline_mode<synchronous>, transform_indices = @transform_4, window_bounds = array<i64: 1, 384>}, {pipeline_mode = #tpu.pipeline_mode<synchronous>, transform_indices = @transform_5, window_bounds = array<i64: 1, 128>}, {transform_indices = @transform_6, window_bounds = array<i64: 64, 128>}, {pipeline_mode = #tpu.pipeline_mode<synchronous>, transform_indices = @transform_7, window_bounds = array<i64: 8, 128>}]} {
    %c0_i32 = arith.constant 0 : i32
    %0 = arith.cmpi eq, %arg0, %c0_i32 : i32
    %1 = arith.extui %0 : i1 to i32
    %c0_i32_0 = arith.constant 0 : i32
    %2 = arith.cmpi ne, %1, %c0_i32_0 : i32
    scf.if %2 {
      %c0_67 = arith.constant 0 : index
      %c0_68 = arith.constant 0 : index
      %279 = vector.load %arg1[%c0_67, %c0_68] : memref<8x128xf32, #tpu.memory_space<vmem>>, vector<8x128xf32>
      %c0_69 = arith.constant 0 : index
      %c0_70 = arith.constant 0 : index
      %280 = vector.load %arg10[%c0_69, %c0_70] : memref<8x128xf32, #tpu.memory_space<vmem>>, vector<8x128xf32>
      tpu.vector_store %arg10[%c0_69, %c0_70], %279 {strides = array<i32>} : memref<8x128xf32, #tpu.memory_space<vmem>>, vector<8x128xf32>,
    } else {
    }
    %c0 = arith.constant 0 : index
    %c0_1 = arith.constant 0 : index
    %3 = vector.load %arg2[%c0, %c0_1] : memref<64x16xf32, #tpu.memory_space<vmem>>, vector<64x16xf32>
    %c0_2 = arith.constant 0 : index
    %c0_3 = arith.constant 0 : index
    %4 = vector.load %arg3[%c0_2, %c0_3] : memref<16x384xf32, #tpu.memory_space<vmem>>, vector<16x384xf32>
    %cst = arith.constant dense<0.000000e+00> : vector<64x384xf32>
    %5 = tpu.matmul %3, %4, %cst {dimension_numbers = #tpu.dot_dimension_numbers<[1], [0], [0], [1], [0, 0, 1, 1], [], []>} : vector<64x16xf32>, vector<16x384xf32>, vector<64x384xf32> -> vector<64x384xf32>
    %c0_4 = arith.constant 0 : index
    %c0_5 = arith.constant 0 : index
    %6 = vector.load %arg5[%c0_4, %c0_5] : memref<1x384xf32, #tpu.memory_space<vmem>>, vector<1x384xf32>
    %7 = vector.broadcast %6 : vector<1x384xf32> to vector<64x384xf32>
    %8 = arith.addf %5, %7 : vector<64x384xf32>
    %c0_6 = arith.constant 0 : index
    %c0_7 = arith.constant 0 : index
    %9 = vector.load %arg9[%c0_6, %c0_7] : memref<64x384xf32, #tpu.memory_space<vmem>>, vector<64x384xf32>
    tpu.vector_store %arg9[%c0_6, %c0_7], %8 {strides = array<i32>} : memref<64x384xf32, #tpu.memory_space<vmem>>, vector<64x384xf32>,
    %c0_8 = arith.constant 0 : index
    %c0_9 = arith.constant 0 : index
    %10 = vector.load %arg4[%c0_8, %c0_9] : memref<128x384xf32, #tpu.memory_space<vmem>>, vector<128x384xf32>
    %c0_10 = arith.constant 0 : index
    %c0_11 = arith.constant 0 : index
    %11 = vector.load %arg6[%c0_10, %c0_11] : memref<1x128xf32, #tpu.memory_space<vmem>>, vector<1x128xf32>
    %c0_12 = arith.constant 0 : index
    %c0_13 = arith.constant 0 : index
    %12 = vector.load %arg10[%c0_12, %c0_13] : memref<8x128xf32, #tpu.memory_space<vmem>>, vector<8x128xf32>
    %c0_i32_14 = arith.constant 0 : i32
    %c8_i32 = arith.constant 8 : i32
    %13 = arith.muli %c0_i32_14, %c8_i32 : i32
    %14 = tpu.assume_multiple %13, 8 : i32
    %15 = arith.index_cast %14 : i32 to index
    %c0_15 = arith.constant 0 : index
    %16 = vector.load %arg9[%15, %c0_15] : memref<64x384xf32, #tpu.memory_space<vmem>>, vector<8x384xf32>
    %cst_16 = arith.constant dense<0.000000e+00> : vector<8x384xf32>
    %17 = tpu.matmul %12, %10, %cst_16 {dimension_numbers = #tpu.dot_dimension_numbers<[1], [0], [0], [1], [0, 0, 1, 1], [], []>} : vector<8x128xf32>, vector<128x384xf32>, vector<8x384xf32> -> vector<8x384xf32>
    %18 = vector.extract_strided_slice %16 {offsets = [0, 0], sizes = [8, 128], strides = [1, 1]} : vector<8x384xf32> to vector<8x128xf32>
    %19 = vector.extract_strided_slice %17 {offsets = [0, 0], sizes = [8, 128], strides = [1, 1]} : vector<8x384xf32> to vector<8x128xf32>
    %20 = arith.addf %18, %19 : vector<8x128xf32>
    %21 = arith.negf %20 : vector<8x128xf32>
    %22 = math.exp %21 : vector<8x128xf32>
    %cst_17 = arith.constant 1.000000e+00 : f32
    %23 = vector.broadcast %cst_17 : f32 to vector<8x128xf32>
    %24 = arith.addf %23, %22 : vector<8x128xf32>
    %25 = arith.divf %23, %24 : vector<8x128xf32>
    %26 = vector.extract_strided_slice %16 {offsets = [0, 128], sizes = [8, 128], strides = [1, 1]} : vector<8x384xf32> to vector<8x128xf32>
    %27 = vector.extract_strided_slice %17 {offsets = [0, 128], sizes = [8, 128], strides = [1, 1]} : vector<8x384xf32> to vector<8x128xf32>
    %28 = arith.addf %26, %27 : vector<8x128xf32>
    %29 = arith.negf %28 : vector<8x128xf32>
    %30 = math.exp %29 : vector<8x128xf32>
    %cst_18 = arith.constant 1.000000e+00 : f32
    %31 = vector.broadcast %cst_18 : f32 to vector<8x128xf32>
    %32 = arith.addf %31, %30 : vector<8x128xf32>
    %33 = arith.divf %31, %32 : vector<8x128xf32>
    %34 = vector.extract_strided_slice %16 {offsets = [0, 256], sizes = [8, 128], strides = [1, 1]} : vector<8x384xf32> to vector<8x128xf32>
    %35 = vector.extract_strided_slice %17 {offsets = [0, 256], sizes = [8, 128], strides = [1, 1]} : vector<8x384xf32> to vector<8x128xf32>
    %36 = vector.broadcast %11 : vector<1x128xf32> to vector<8x128xf32>
    %37 = arith.addf %35, %36 : vector<8x128xf32>
    %38 = arith.mulf %25, %37 : vector<8x128xf32>
    %39 = arith.addf %34, %38 : vector<8x128xf32>
    %40 = math.tanh %39 : vector<8x128xf32>
    %41 = arith.subf %12, %40 : vector<8x128xf32>
    %42 = arith.mulf %33, %41 : vector<8x128xf32>
    %43 = arith.addf %40, %42 : vector<8x128xf32>
    %44 = arith.index_cast %14 : i32 to index
    %c0_19 = arith.constant 0 : index
    %45 = vector.load %arg7[%44, %c0_19] : memref<64x128xf32, #tpu.memory_space<vmem>>, vector<8x128xf32>
    tpu.vector_store %arg7[%44, %c0_19], %43 {strides = array<i32>} : memref<64x128xf32, #tpu.memory_space<vmem>>, vector<8x128xf32>,
    %c1_i32 = arith.constant 1 : i32
    %c8_i32_20 = arith.constant 8 : i32
    %46 = arith.muli %c1_i32, %c8_i32_20 : i32
    %47 = tpu.assume_multiple %46, 8 : i32
    %48 = arith.index_cast %47 : i32 to index
    %c0_21 = arith.constant 0 : index
    %49 = vector.load %arg9[%48, %c0_21] : memref<64x384xf32, #tpu.memory_space<vmem>>, vector<8x384xf32>
    %cst_22 = arith.constant dense<0.000000e+00> : vector<8x384xf32>
    %50 = tpu.matmul %43, %10, %cst_22 {dimension_numbers = #tpu.dot_dimension_numbers<[1], [0], [0], [1], [0, 0, 1, 1], [], []>} : vector<8x128xf32>, vector<128x384xf32>, vector<8x384xf32> -> vector<8x384xf32>
    %51 = vector.extract_strided_slice %49 {offsets = [0, 0], sizes = [8, 128], strides = [1, 1]} : vector<8x384xf32> to vector<8x128xf32>
    %52 = vector.extract_strided_slice %50 {offsets = [0, 0], sizes = [8, 128], strides = [1, 1]} : vector<8x384xf32> to vector<8x128xf32>
    %53 = arith.addf %51, %52 : vector<8x128xf32>
    %54 = arith.negf %53 : vector<8x128xf32>
    %55 = math.exp %54 : vector<8x128xf32>
    %cst_23 = arith.constant 1.000000e+00 : f32
    %56 = vector.broadcast %cst_23 : f32 to vector<8x128xf32>
    %57 = arith.addf %56, %55 : vector<8x128xf32>
    %58 = arith.divf %56, %57 : vector<8x128xf32>
    %59 = vector.extract_strided_slice %49 {offsets = [0, 128], sizes = [8, 128], strides = [1, 1]} : vector<8x384xf32> to vector<8x128xf32>
    %60 = vector.extract_strided_slice %50 {offsets = [0, 128], sizes = [8, 128], strides = [1, 1]} : vector<8x384xf32> to vector<8x128xf32>
    %61 = arith.addf %59, %60 : vector<8x128xf32>
    %62 = arith.negf %61 : vector<8x128xf32>
    %63 = math.exp %62 : vector<8x128xf32>
    %cst_24 = arith.constant 1.000000e+00 : f32
    %64 = vector.broadcast %cst_24 : f32 to vector<8x128xf32>
    %65 = arith.addf %64, %63 : vector<8x128xf32>
    %66 = arith.divf %64, %65 : vector<8x128xf32>
    %67 = vector.extract_strided_slice %49 {offsets = [0, 256], sizes = [8, 128], strides = [1, 1]} : vector<8x384xf32> to vector<8x128xf32>
    %68 = vector.extract_strided_slice %50 {offsets = [0, 256], sizes = [8, 128], strides = [1, 1]} : vector<8x384xf32> to vector<8x128xf32>
    %69 = vector.broadcast %11 : vector<1x128xf32> to vector<8x128xf32>
    %70 = arith.addf %68, %69 : vector<8x128xf32>
    %71 = arith.mulf %58, %70 : vector<8x128xf32>
    %72 = arith.addf %67, %71 : vector<8x128xf32>
    %73 = math.tanh %72 : vector<8x128xf32>
    %74 = arith.subf %43, %73 : vector<8x128xf32>
    %75 = arith.mulf %66, %74 : vector<8x128xf32>
    %76 = arith.addf %73, %75 : vector<8x128xf32>
    %77 = arith.index_cast %47 : i32 to index
    %c0_25 = arith.constant 0 : index
    %78 = vector.load %arg7[%77, %c0_25] : memref<64x128xf32, #tpu.memory_space<vmem>>, vector<8x128xf32>
    tpu.vector_store %arg7[%77, %c0_25], %76 {strides = array<i32>} : memref<64x128xf32, #tpu.memory_space<vmem>>, vector<8x128xf32>,
    %c2_i32 = arith.constant 2 : i32
    %c8_i32_26 = arith.constant 8 : i32
    %79 = arith.muli %c2_i32, %c8_i32_26 : i32
    %80 = tpu.assume_multiple %79, 8 : i32
    %81 = arith.index_cast %80 : i32 to index
    %c0_27 = arith.constant 0 : index
    %82 = vector.load %arg9[%81, %c0_27] : memref<64x384xf32, #tpu.memory_space<vmem>>, vector<8x384xf32>
    %cst_28 = arith.constant dense<0.000000e+00> : vector<8x384xf32>
    %83 = tpu.matmul %76, %10, %cst_28 {dimension_numbers = #tpu.dot_dimension_numbers<[1], [0], [0], [1], [0, 0, 1, 1], [], []>} : vector<8x128xf32>, vector<128x384xf32>, vector<8x384xf32> -> vector<8x384xf32>
    %84 = vector.extract_strided_slice %82 {offsets = [0, 0], sizes = [8, 128], strides = [1, 1]} : vector<8x384xf32> to vector<8x128xf32>
    %85 = vector.extract_strided_slice %83 {offsets = [0, 0], sizes = [8, 128], strides = [1, 1]} : vector<8x384xf32> to vector<8x128xf32>
    %86 = arith.addf %84, %85 : vector<8x128xf32>
    %87 = arith.negf %86 : vector<8x128xf32>
    %88 = math.exp %87 : vector<8x128xf32>
    %cst_29 = arith.constant 1.000000e+00 : f32
    %89 = vector.broadcast %cst_29 : f32 to vector<8x128xf32>
    %90 = arith.addf %89, %88 : vector<8x128xf32>
    %91 = arith.divf %89, %90 : vector<8x128xf32>
    %92 = vector.extract_strided_slice %82 {offsets = [0, 128], sizes = [8, 128], strides = [1, 1]} : vector<8x384xf32> to vector<8x128xf32>
    %93 = vector.extract_strided_slice %83 {offsets = [0, 128], sizes = [8, 128], strides = [1, 1]} : vector<8x384xf32> to vector<8x128xf32>
    %94 = arith.addf %92, %93 : vector<8x128xf32>
    %95 = arith.negf %94 : vector<8x128xf32>
    %96 = math.exp %95 : vector<8x128xf32>
    %cst_30 = arith.constant 1.000000e+00 : f32
    %97 = vector.broadcast %cst_30 : f32 to vector<8x128xf32>
    %98 = arith.addf %97, %96 : vector<8x128xf32>
    %99 = arith.divf %97, %98 : vector<8x128xf32>
    %100 = vector.extract_strided_slice %82 {offsets = [0, 256], sizes = [8, 128], strides = [1, 1]} : vector<8x384xf32> to vector<8x128xf32>
    %101 = vector.extract_strided_slice %83 {offsets = [0, 256], sizes = [8, 128], strides = [1, 1]} : vector<8x384xf32> to vector<8x128xf32>
    %102 = vector.broadcast %11 : vector<1x128xf32> to vector<8x128xf32>
    %103 = arith.addf %101, %102 : vector<8x128xf32>
    %104 = arith.mulf %91, %103 : vector<8x128xf32>
    %105 = arith.addf %100, %104 : vector<8x128xf32>
    %106 = math.tanh %105 : vector<8x128xf32>
    %107 = arith.subf %76, %106 : vector<8x128xf32>
    %108 = arith.mulf %99, %107 : vector<8x128xf32>
    %109 = arith.addf %106, %108 : vector<8x128xf32>
    %110 = arith.index_cast %80 : i32 to index
    %c0_31 = arith.constant 0 : index
    %111 = vector.load %arg7[%110, %c0_31] : memref<64x128xf32, #tpu.memory_space<vmem>>, vector<8x128xf32>
    tpu.vector_store %arg7[%110, %c0_31], %109 {strides = array<i32>} : memref<64x128xf32, #tpu.memory_space<vmem>>, vector<8x128xf32>,
    %c3_i32 = arith.constant 3 : i32
    %c8_i32_32 = arith.constant 8 : i32
    %112 = arith.muli %c3_i32, %c8_i32_32 : i32
    %113 = tpu.assume_multiple %112, 8 : i32
    %114 = arith.index_cast %113 : i32 to index
    %c0_33 = arith.constant 0 : index
    %115 = vector.load %arg9[%114, %c0_33] : memref<64x384xf32, #tpu.memory_space<vmem>>, vector<8x384xf32>
    %cst_34 = arith.constant dense<0.000000e+00> : vector<8x384xf32>
    %116 = tpu.matmul %109, %10, %cst_34 {dimension_numbers = #tpu.dot_dimension_numbers<[1], [0], [0], [1], [0, 0, 1, 1], [], []>} : vector<8x128xf32>, vector<128x384xf32>, vector<8x384xf32> -> vector<8x384xf32>
    %117 = vector.extract_strided_slice %115 {offsets = [0, 0], sizes = [8, 128], strides = [1, 1]} : vector<8x384xf32> to vector<8x128xf32>
    %118 = vector.extract_strided_slice %116 {offsets = [0, 0], sizes = [8, 128], strides = [1, 1]} : vector<8x384xf32> to vector<8x128xf32>
    %119 = arith.addf %117, %118 : vector<8x128xf32>
    %120 = arith.negf %119 : vector<8x128xf32>
    %121 = math.exp %120 : vector<8x128xf32>
    %cst_35 = arith.constant 1.000000e+00 : f32
    %122 = vector.broadcast %cst_35 : f32 to vector<8x128xf32>
    %123 = arith.addf %122, %121 : vector<8x128xf32>
    %124 = arith.divf %122, %123 : vector<8x128xf32>
    %125 = vector.extract_strided_slice %115 {offsets = [0, 128], sizes = [8, 128], strides = [1, 1]} : vector<8x384xf32> to vector<8x128xf32>
    %126 = vector.extract_strided_slice %116 {offsets = [0, 128], sizes = [8, 128], strides = [1, 1]} : vector<8x384xf32> to vector<8x128xf32>
    %127 = arith.addf %125, %126 : vector<8x128xf32>
    %128 = arith.negf %127 : vector<8x128xf32>
    %129 = math.exp %128 : vector<8x128xf32>
    %cst_36 = arith.constant 1.000000e+00 : f32
    %130 = vector.broadcast %cst_36 : f32 to vector<8x128xf32>
    %131 = arith.addf %130, %129 : vector<8x128xf32>
    %132 = arith.divf %130, %131 : vector<8x128xf32>
    %133 = vector.extract_strided_slice %115 {offsets = [0, 256], sizes = [8, 128], strides = [1, 1]} : vector<8x384xf32> to vector<8x128xf32>
    %134 = vector.extract_strided_slice %116 {offsets = [0, 256], sizes = [8, 128], strides = [1, 1]} : vector<8x384xf32> to vector<8x128xf32>
    %135 = vector.broadcast %11 : vector<1x128xf32> to vector<8x128xf32>
    %136 = arith.addf %134, %135 : vector<8x128xf32>
    %137 = arith.mulf %124, %136 : vector<8x128xf32>
    %138 = arith.addf %133, %137 : vector<8x128xf32>
    %139 = math.tanh %138 : vector<8x128xf32>
    %140 = arith.subf %109, %139 : vector<8x128xf32>
    %141 = arith.mulf %132, %140 : vector<8x128xf32>
    %142 = arith.addf %139, %141 : vector<8x128xf32>
    %143 = arith.index_cast %113 : i32 to index
    %c0_37 = arith.constant 0 : index
    %144 = vector.load %arg7[%143, %c0_37] : memref<64x128xf32, #tpu.memory_space<vmem>>, vector<8x128xf32>
    tpu.vector_store %arg7[%143, %c0_37], %142 {strides = array<i32>} : memref<64x128xf32, #tpu.memory_space<vmem>>, vector<8x128xf32>,
    %c4_i32 = arith.constant 4 : i32
    %c8_i32_38 = arith.constant 8 : i32
    %145 = arith.muli %c4_i32, %c8_i32_38 : i32
    %146 = tpu.assume_multiple %145, 8 : i32
    %147 = arith.index_cast %146 : i32 to index
    %c0_39 = arith.constant 0 : index
    %148 = vector.load %arg9[%147, %c0_39] : memref<64x384xf32, #tpu.memory_space<vmem>>, vector<8x384xf32>
    %cst_40 = arith.constant dense<0.000000e+00> : vector<8x384xf32>
    %149 = tpu.matmul %142, %10, %cst_40 {dimension_numbers = #tpu.dot_dimension_numbers<[1], [0], [0], [1], [0, 0, 1, 1], [], []>} : vector<8x128xf32>, vector<128x384xf32>, vector<8x384xf32> -> vector<8x384xf32>
    %150 = vector.extract_strided_slice %148 {offsets = [0, 0], sizes = [8, 128], strides = [1, 1]} : vector<8x384xf32> to vector<8x128xf32>
    %151 = vector.extract_strided_slice %149 {offsets = [0, 0], sizes = [8, 128], strides = [1, 1]} : vector<8x384xf32> to vector<8x128xf32>
    %152 = arith.addf %150, %151 : vector<8x128xf32>
    %153 = arith.negf %152 : vector<8x128xf32>
    %154 = math.exp %153 : vector<8x128xf32>
    %cst_41 = arith.constant 1.000000e+00 : f32
    %155 = vector.broadcast %cst_41 : f32 to vector<8x128xf32>
    %156 = arith.addf %155, %154 : vector<8x128xf32>
    %157 = arith.divf %155, %156 : vector<8x128xf32>
    %158 = vector.extract_strided_slice %148 {offsets = [0, 128], sizes = [8, 128], strides = [1, 1]} : vector<8x384xf32> to vector<8x128xf32>
    %159 = vector.extract_strided_slice %149 {offsets = [0, 128], sizes = [8, 128], strides = [1, 1]} : vector<8x384xf32> to vector<8x128xf32>
    %160 = arith.addf %158, %159 : vector<8x128xf32>
    %161 = arith.negf %160 : vector<8x128xf32>
    %162 = math.exp %161 : vector<8x128xf32>
    %cst_42 = arith.constant 1.000000e+00 : f32
    %163 = vector.broadcast %cst_42 : f32 to vector<8x128xf32>
    %164 = arith.addf %163, %162 : vector<8x128xf32>
    %165 = arith.divf %163, %164 : vector<8x128xf32>
    %166 = vector.extract_strided_slice %148 {offsets = [0, 256], sizes = [8, 128], strides = [1, 1]} : vector<8x384xf32> to vector<8x128xf32>
    %167 = vector.extract_strided_slice %149 {offsets = [0, 256], sizes = [8, 128], strides = [1, 1]} : vector<8x384xf32> to vector<8x128xf32>
    %168 = vector.broadcast %11 : vector<1x128xf32> to vector<8x128xf32>
    %169 = arith.addf %167, %168 : vector<8x128xf32>
    %170 = arith.mulf %157, %169 : vector<8x128xf32>
    %171 = arith.addf %166, %170 : vector<8x128xf32>
    %172 = math.tanh %171 : vector<8x128xf32>
    %173 = arith.subf %142, %172 : vector<8x128xf32>
    %174 = arith.mulf %165, %173 : vector<8x128xf32>
    %175 = arith.addf %172, %174 : vector<8x128xf32>
    %176 = arith.index_cast %146 : i32 to index
    %c0_43 = arith.constant 0 : index
    %177 = vector.load %arg7[%176, %c0_43] : memref<64x128xf32, #tpu.memory_space<vmem>>, vector<8x128xf32>
    tpu.vector_store %arg7[%176, %c0_43], %175 {strides = array<i32>} : memref<64x128xf32, #tpu.memory_space<vmem>>, vector<8x128xf32>,
    %c5_i32 = arith.constant 5 : i32
    %c8_i32_44 = arith.constant 8 : i32
    %178 = arith.muli %c5_i32, %c8_i32_44 : i32
    %179 = tpu.assume_multiple %178, 8 : i32
    %180 = arith.index_cast %179 : i32 to index
    %c0_45 = arith.constant 0 : index
    %181 = vector.load %arg9[%180, %c0_45] : memref<64x384xf32, #tpu.memory_space<vmem>>, vector<8x384xf32>
    %cst_46 = arith.constant dense<0.000000e+00> : vector<8x384xf32>
    %182 = tpu.matmul %175, %10, %cst_46 {dimension_numbers = #tpu.dot_dimension_numbers<[1], [0], [0], [1], [0, 0, 1, 1], [], []>} : vector<8x128xf32>, vector<128x384xf32>, vector<8x384xf32> -> vector<8x384xf32>
    %183 = vector.extract_strided_slice %181 {offsets = [0, 0], sizes = [8, 128], strides = [1, 1]} : vector<8x384xf32> to vector<8x128xf32>
    %184 = vector.extract_strided_slice %182 {offsets = [0, 0], sizes = [8, 128], strides = [1, 1]} : vector<8x384xf32> to vector<8x128xf32>
    %185 = arith.addf %183, %184 : vector<8x128xf32>
    %186 = arith.negf %185 : vector<8x128xf32>
    %187 = math.exp %186 : vector<8x128xf32>
    %cst_47 = arith.constant 1.000000e+00 : f32
    %188 = vector.broadcast %cst_47 : f32 to vector<8x128xf32>
    %189 = arith.addf %188, %187 : vector<8x128xf32>
    %190 = arith.divf %188, %189 : vector<8x128xf32>
    %191 = vector.extract_strided_slice %181 {offsets = [0, 128], sizes = [8, 128], strides = [1, 1]} : vector<8x384xf32> to vector<8x128xf32>
    %192 = vector.extract_strided_slice %182 {offsets = [0, 128], sizes = [8, 128], strides = [1, 1]} : vector<8x384xf32> to vector<8x128xf32>
    %193 = arith.addf %191, %192 : vector<8x128xf32>
    %194 = arith.negf %193 : vector<8x128xf32>
    %195 = math.exp %194 : vector<8x128xf32>
    %cst_48 = arith.constant 1.000000e+00 : f32
    %196 = vector.broadcast %cst_48 : f32 to vector<8x128xf32>
    %197 = arith.addf %196, %195 : vector<8x128xf32>
    %198 = arith.divf %196, %197 : vector<8x128xf32>
    %199 = vector.extract_strided_slice %181 {offsets = [0, 256], sizes = [8, 128], strides = [1, 1]} : vector<8x384xf32> to vector<8x128xf32>
    %200 = vector.extract_strided_slice %182 {offsets = [0, 256], sizes = [8, 128], strides = [1, 1]} : vector<8x384xf32> to vector<8x128xf32>
    %201 = vector.broadcast %11 : vector<1x128xf32> to vector<8x128xf32>
    %202 = arith.addf %200, %201 : vector<8x128xf32>
    %203 = arith.mulf %190, %202 : vector<8x128xf32>
    %204 = arith.addf %199, %203 : vector<8x128xf32>
    %205 = math.tanh %204 : vector<8x128xf32>
    %206 = arith.subf %175, %205 : vector<8x128xf32>
    %207 = arith.mulf %198, %206 : vector<8x128xf32>
    %208 = arith.addf %205, %207 : vector<8x128xf32>
    %209 = arith.index_cast %179 : i32 to index
    %c0_49 = arith.constant 0 : index
    %210 = vector.load %arg7[%209, %c0_49] : memref<64x128xf32, #tpu.memory_space<vmem>>, vector<8x128xf32>
    tpu.vector_store %arg7[%209, %c0_49], %208 {strides = array<i32>} : memref<64x128xf32, #tpu.memory_space<vmem>>, vector<8x128xf32>,
    %c6_i32 = arith.constant 6 : i32
    %c8_i32_50 = arith.constant 8 : i32
    %211 = arith.muli %c6_i32, %c8_i32_50 : i32
    %212 = tpu.assume_multiple %211, 8 : i32
    %213 = arith.index_cast %212 : i32 to index
    %c0_51 = arith.constant 0 : index
    %214 = vector.load %arg9[%213, %c0_51] : memref<64x384xf32, #tpu.memory_space<vmem>>, vector<8x384xf32>
    %cst_52 = arith.constant dense<0.000000e+00> : vector<8x384xf32>
    %215 = tpu.matmul %208, %10, %cst_52 {dimension_numbers = #tpu.dot_dimension_numbers<[1], [0], [0], [1], [0, 0, 1, 1], [], []>} : vector<8x128xf32>, vector<128x384xf32>, vector<8x384xf32> -> vector<8x384xf32>
    %216 = vector.extract_strided_slice %214 {offsets = [0, 0], sizes = [8, 128], strides = [1, 1]} : vector<8x384xf32> to vector<8x128xf32>
    %217 = vector.extract_strided_slice %215 {offsets = [0, 0], sizes = [8, 128], strides = [1, 1]} : vector<8x384xf32> to vector<8x128xf32>
    %218 = arith.addf %216, %217 : vector<8x128xf32>
    %219 = arith.negf %218 : vector<8x128xf32>
    %220 = math.exp %219 : vector<8x128xf32>
    %cst_53 = arith.constant 1.000000e+00 : f32
    %221 = vector.broadcast %cst_53 : f32 to vector<8x128xf32>
    %222 = arith.addf %221, %220 : vector<8x128xf32>
    %223 = arith.divf %221, %222 : vector<8x128xf32>
    %224 = vector.extract_strided_slice %214 {offsets = [0, 128], sizes = [8, 128], strides = [1, 1]} : vector<8x384xf32> to vector<8x128xf32>
    %225 = vector.extract_strided_slice %215 {offsets = [0, 128], sizes = [8, 128], strides = [1, 1]} : vector<8x384xf32> to vector<8x128xf32>
    %226 = arith.addf %224, %225 : vector<8x128xf32>
    %227 = arith.negf %226 : vector<8x128xf32>
    %228 = math.exp %227 : vector<8x128xf32>
    %cst_54 = arith.constant 1.000000e+00 : f32
    %229 = vector.broadcast %cst_54 : f32 to vector<8x128xf32>
    %230 = arith.addf %229, %228 : vector<8x128xf32>
    %231 = arith.divf %229, %230 : vector<8x128xf32>
    %232 = vector.extract_strided_slice %214 {offsets = [0, 256], sizes = [8, 128], strides = [1, 1]} : vector<8x384xf32> to vector<8x128xf32>
    %233 = vector.extract_strided_slice %215 {offsets = [0, 256], sizes = [8, 128], strides = [1, 1]} : vector<8x384xf32> to vector<8x128xf32>
    %234 = vector.broadcast %11 : vector<1x128xf32> to vector<8x128xf32>
    %235 = arith.addf %233, %234 : vector<8x128xf32>
    %236 = arith.mulf %223, %235 : vector<8x128xf32>
    %237 = arith.addf %232, %236 : vector<8x128xf32>
    %238 = math.tanh %237 : vector<8x128xf32>
    %239 = arith.subf %208, %238 : vector<8x128xf32>
    %240 = arith.mulf %231, %239 : vector<8x128xf32>
    %241 = arith.addf %238, %240 : vector<8x128xf32>
    %242 = arith.index_cast %212 : i32 to index
    %c0_55 = arith.constant 0 : index
    %243 = vector.load %arg7[%242, %c0_55] : memref<64x128xf32, #tpu.memory_space<vmem>>, vector<8x128xf32>
    tpu.vector_store %arg7[%242, %c0_55], %241 {strides = array<i32>} : memref<64x128xf32, #tpu.memory_space<vmem>>, vector<8x128xf32>,
    %c7_i32 = arith.constant 7 : i32
    %c8_i32_56 = arith.constant 8 : i32
    %244 = arith.muli %c7_i32, %c8_i32_56 : i32
    %245 = tpu.assume_multiple %244, 8 : i32
    %246 = arith.index_cast %245 : i32 to index
    %c0_57 = arith.constant 0 : index
    %247 = vector.load %arg9[%246, %c0_57] : memref<64x384xf32, #tpu.memory_space<vmem>>, vector<8x384xf32>
    %cst_58 = arith.constant dense<0.000000e+00> : vector<8x384xf32>
    %248 = tpu.matmul %241, %10, %cst_58 {dimension_numbers = #tpu.dot_dimension_numbers<[1], [0], [0], [1], [0, 0, 1, 1], [], []>} : vector<8x128xf32>, vector<128x384xf32>, vector<8x384xf32> -> vector<8x384xf32>
    %249 = vector.extract_strided_slice %247 {offsets = [0, 0], sizes = [8, 128], strides = [1, 1]} : vector<8x384xf32> to vector<8x128xf32>
    %250 = vector.extract_strided_slice %248 {offsets = [0, 0], sizes = [8, 128], strides = [1, 1]} : vector<8x384xf32> to vector<8x128xf32>
    %251 = arith.addf %249, %250 : vector<8x128xf32>
    %252 = arith.negf %251 : vector<8x128xf32>
    %253 = math.exp %252 : vector<8x128xf32>
    %cst_59 = arith.constant 1.000000e+00 : f32
    %254 = vector.broadcast %cst_59 : f32 to vector<8x128xf32>
    %255 = arith.addf %254, %253 : vector<8x128xf32>
    %256 = arith.divf %254, %255 : vector<8x128xf32>
    %257 = vector.extract_strided_slice %247 {offsets = [0, 128], sizes = [8, 128], strides = [1, 1]} : vector<8x384xf32> to vector<8x128xf32>
    %258 = vector.extract_strided_slice %248 {offsets = [0, 128], sizes = [8, 128], strides = [1, 1]} : vector<8x384xf32> to vector<8x128xf32>
    %259 = arith.addf %257, %258 : vector<8x128xf32>
    %260 = arith.negf %259 : vector<8x128xf32>
    %261 = math.exp %260 : vector<8x128xf32>
    %cst_60 = arith.constant 1.000000e+00 : f32
    %262 = vector.broadcast %cst_60 : f32 to vector<8x128xf32>
    %263 = arith.addf %262, %261 : vector<8x128xf32>
    %264 = arith.divf %262, %263 : vector<8x128xf32>
    %265 = vector.extract_strided_slice %247 {offsets = [0, 256], sizes = [8, 128], strides = [1, 1]} : vector<8x384xf32> to vector<8x128xf32>
    %266 = vector.extract_strided_slice %248 {offsets = [0, 256], sizes = [8, 128], strides = [1, 1]} : vector<8x384xf32> to vector<8x128xf32>
    %267 = vector.broadcast %11 : vector<1x128xf32> to vector<8x128xf32>
    %268 = arith.addf %266, %267 : vector<8x128xf32>
    %269 = arith.mulf %256, %268 : vector<8x128xf32>
    %270 = arith.addf %265, %269 : vector<8x128xf32>
    %271 = math.tanh %270 : vector<8x128xf32>
    %272 = arith.subf %241, %271 : vector<8x128xf32>
    %273 = arith.mulf %264, %272 : vector<8x128xf32>
    %274 = arith.addf %271, %273 : vector<8x128xf32>
    %275 = arith.index_cast %245 : i32 to index
    %c0_61 = arith.constant 0 : index
    %276 = vector.load %arg7[%275, %c0_61] : memref<64x128xf32, #tpu.memory_space<vmem>>, vector<8x128xf32>
    tpu.vector_store %arg7[%275, %c0_61], %274 {strides = array<i32>} : memref<64x128xf32, #tpu.memory_space<vmem>>, vector<8x128xf32>,
    %c8_i32_62 = arith.constant 8 : i32
    %c0_63 = arith.constant 0 : index
    %c0_64 = arith.constant 0 : index
    %277 = vector.load %arg10[%c0_63, %c0_64] : memref<8x128xf32, #tpu.memory_space<vmem>>, vector<8x128xf32>
    tpu.vector_store %arg10[%c0_63, %c0_64], %274 {strides = array<i32>} : memref<8x128xf32, #tpu.memory_space<vmem>>, vector<8x128xf32>,
    %c0_65 = arith.constant 0 : index
    %c0_66 = arith.constant 0 : index
    %278 = vector.load %arg8[%c0_65, %c0_66] : memref<8x128xf32, #tpu.memory_space<vmem>>, vector<8x128xf32>
    tpu.vector_store %arg8[%c0_65, %c0_66], %274 {strides = array<i32>} : memref<8x128xf32, #tpu.memory_space<vmem>>, vector<8x128xf32>,
    return
  }
  func.func @transform_0(%arg0: i32) -> (i32, i32) {
    %c0_i32 = arith.constant 0 : i32
    %c0_i32_0 = arith.constant 0 : i32
    %c0_i32_1 = arith.constant 0 : i32
    return %c0_i32, %c0_i32_0 : i32, i32
  }
  func.func @transform_1(%arg0: i32) -> (i32, i32) {
    %c0_i32 = arith.constant 0 : i32
    %c0_i32_0 = arith.constant 0 : i32
    return %arg0, %c0_i32 : i32, i32
  }
  func.func @transform_2(%arg0: i32) -> (i32, i32) {
    %c0_i32 = arith.constant 0 : i32
    %c0_i32_0 = arith.constant 0 : i32
    %c0_i32_1 = arith.constant 0 : i32
    return %c0_i32, %c0_i32_0 : i32, i32
  }
  func.func @transform_3(%arg0: i32) -> (i32, i32) {
    %c0_i32 = arith.constant 0 : i32
    %c0_i32_0 = arith.constant 0 : i32
    %c0_i32_1 = arith.constant 0 : i32
    return %c0_i32, %c0_i32_0 : i32, i32
  }
  func.func @transform_4(%arg0: i32) -> (i32, i32) {
    %c0_i32 = arith.constant 0 : i32
    %c0_i32_0 = arith.constant 0 : i32
    %c0_i32_1 = arith.constant 0 : i32
    return %c0_i32, %c0_i32_0 : i32, i32
  }
  func.func @transform_5(%arg0: i32) -> (i32, i32) {
    %c0_i32 = arith.constant 0 : i32
    %c0_i32_0 = arith.constant 0 : i32
    %c0_i32_1 = arith.constant 0 : i32
    return %c0_i32, %c0_i32_0 : i32, i32
  }
  func.func @transform_6(%arg0: i32) -> (i32, i32) {
    %c0_i32 = arith.constant 0 : i32
    %c0_i32_0 = arith.constant 0 : i32
    return %arg0, %c0_i32 : i32, i32
  }
  func.func @transform_7(%arg0: i32) -> (i32, i32) {
    %c0_i32 = arith.constant 0 : i32
    %c0_i32_0 = arith.constant 0 : i32
    %c0_i32_1 = arith.constant 0 : i32
    return %c0_i32, %c0_i32_0 : i32, i32
  }
}

</mosaic_0001>

<bundles_post_ra>
// kernel: tpu_custom_call.1
= control target key start
LH: loop header
LB: loop body
LE: loop exit
PB: predicated region body
PF: predicated region fallthrough
CT: control target
= control target key end

     0   :  { %13 = vsyncpa [#allocation5], 0  ;;  %s3507_s0 = inlined_call_operand.vmem [shape: f32[8,128], index: 0, kind: input, shape index: {}]   ;;  %s3508_s1 = inlined_call_operand.vmem [shape: f32[64,16], index: 1, kind: input, shape index: {}]   ;;  %s3509_s2 = inlined_call_operand.vmem [shape: f32[16,384], index: 2, kind: input, shape index: {}]   ;;  %s3510_s3 = inlined_call_operand.hbm [shape: f32[128,384], index: 3, kind: input, shape index: {}]   ;;  %s3511_s4 = inlined_call_operand.vmem [shape: f32[1,384], index: 4, kind: input, shape index: {}]   ;;  %s3512_s5 = inlined_call_operand.vmem [shape: f32[1,128], index: 5, kind: input, shape index: {}]   ;;  %s3513_s6 = inlined_call_operand.hbm [shape: f32[64,128], index: 6, kind: output, shape index: {0}]   ;;  %s3514_s7 = inlined_call_operand.hbm [shape: f32[8,128], index: 7, kind: output, shape index: {1}]  }
   0x1   :  { %14 = vsyncpa [#allocation6], 0 }
   0x2   :  { %15 = vsyncpa [#allocation9], 0  ;;  %s2925_s24 = smov [#allocation4]   ;;  %s2853_s28 = scalar_lea.hbm %s3510_s3, 6144 }
   0x3   :  { %s27_s25 = sshll.u32 %s2925_s24, 4  ;;  %p2854_p0 = scmp.ne.s32.totalorder %s3510_s3, %s2853_s28  ;;  %s28_s25 = int_to_ptr.vmem [resolvable:$true] %s27_s25 }
   0x4   :  { %p2857_p1 = scmp.lt.u32.totalorder %s2853_s28, %s3510_s3 }
   0x6   :  { %p2859_p2 = pnand %p2857_p1, %p2854_p0 }
   0x8   :  { %2862 = shalt.err (!%p2859_p2)
}
   0x9   :  { %s2863_s10 = scalar_lea.vmem %s28_s25, 6144  ;;  %p2868_p4 = scmp.lt.s32.totalorder %s28_s25, %s28_s25 }
   0xa   :  { %p2864_p3 = scmp.ne.s32.totalorder %s28_s25, %s2863_s10  ;;  %p2869_p5 = scmp.lt.s32.totalorder %s2863_s10, %s2863_s10 }
   0xc   :  { %p2870_p6 = por %p2869_p5, %p2868_p4 }
   0xe   :  { %p2871_p7 = pnand %p2870_p6, %p2864_p3 }
  0x10   :  { %2874 = shalt.err (!%p2871_p7)
}
  0x11   :  { %s2926_s11 = smov 384   ;;  %s2927_s12 = smov 24  }
  0x12   :  { %33 = dma.hbm_to_vmem [thread:$0]  %s3510_s3, 6144, %s28_s25, [#allocation5], %s2926_s11, %s2926_s11, %s2927_s12  }
  0x13   :  { %2919 = dma.done.wait [#allocation5], 6144  }
  0x14   :  { %2920 = vsyncadd [#allocation5], 4294961152  ;;  %v2928_v0 = vmov 0.0   ;;  %v56_v1 = vld [vmem:[%s3509_s2 + $0x8] sm:$0xff]  ;;  %v59_v2 = vld [vmem:[%s3509_s2 + $0x20] sm:$0xff]  ;;  %vm78_vm0 = vcmask 130048  }
  0x15   :  { %167 = vmatprep.mubr.f32.mxu0 %v2928_v0  ;;  %v55_v3 = vld [vmem:[%s3509_s2] sm:$0xff]  ;;  %v2275_v4 = vpack.c.bf16 %v59_v2, %v56_v1  ;;  %v58_v5 = vld [vmem:[%s3509_s2 + $0x18] sm:$0xff]  ;;  %v346_v7 = vld [vmem:[#allocation4 + $0x8] sm:$0xff]  ;;  %v2929_v48 = vmov 0.0|0.0   ;;  %vm2930_vm1 = vmmov 0   ;;  %s2932_s3 = smov [#allocation8]  }
  0x16   :  { %v47_v6 = vld [vmem:[%s3508_s1] sm:$0xff]  ;;  %v2277_v8 = vpack.c.bf16 %v58_v5, %v55_v3  ;;  %v348_v11 = vld [vmem:[#allocation4 + $0x18] sm:$0xff]  ;;  %v355_v14 = vld [vmem:[#allocation4 + $0x50] sm:$0xff]  ;;  %s1780_s22 = sshll.u32 %s2932_s3, 4  ;;  %s3476_s22 = int_to_ptr.vmem [resolvable:$true] %s1780_s22 }
  0x17   :  { %v349_v9 = vld [vmem:[#allocation4 + $0x20] sm:$0xff]  ;;  %1983 = vmatprep.mubr.msk.f32.mxu1 %vm78_vm0, %v47_v6  ;;  %2276 = vmatprep.subr.bf16.mxu0 %v2275_v4  ;;  %v352_v13 = vld [vmem:[#allocation4 + $0x38] sm:$0xff]  ;;  %v351_v17 = vld [vmem:[#allocation4 + $0x30] sm:$0xff] }
  0x18   :  { %v345_v10 = vld [vmem:[#allocation4] sm:$0xff]  ;;  %v3004_v12 = vpack.c.bf16 %v349_v9, %v346_v7  ;;  %2278 = vmatpush1.bf16.msra.mxu0 %v2277_v8  ;;  %v3009_v16 = vpack.c.bf16 %v355_v14, %v352_v13  ;;  %v354_v18 = vld [vmem:[#allocation4 + $0x48] sm:$0xff]  ;;  %v360_v25 = vld [vmem:[#allocation4 + $0x78] sm:$0xff] }
  0x19   :  { %v3006_v15 = vpack.c.bf16 %v348_v11, %v345_v10  ;;  %v358_v19 = vld [vmem:[#allocation4 + $0x68] sm:$0xff]  ;;  %v361_v20 = vld [vmem:[#allocation4 + $0x80] sm:$0xff]  ;;  %v3017_v22 = vpack.c.bf16 %v354_v18, %v351_v17  ;;  %v364_v26 = vld [vmem:[#allocation4 + $0x98] sm:$0xff] }
  0x1a   :  { %2284 = vmatprep.subr.bf16.mxu0 %v3004_v12  ;;  %v48_v21 = vld [vmem:[%s3508_s1 + $0x8] sm:$0xff]  ;;  %v3020_v23 = vpack.c.bf16 %v361_v20, %v358_v19  ;;  %v357_v24 = vld [vmem:[#allocation4 + $0x60] sm:$0xff]  ;;  %v367_v27 = vld [vmem:[#allocation4 + $0xb0] sm:$0xff] }
  0x1b   :  { %1800 = vmatmul.mubr.msk.f32.vlgmr.msra.gmra.mrb[0].mxu0 %vm78_vm0, %v47_v6  ;;  %v57_v28 = vld [vmem:[%s3509_s2 + $0x10] sm:$0xff]  ;;  %v60_v29 = vld [vmem:[%s3509_s2 + $0x28] sm:$0xff]  ;;  %v3034_v31 = vpack.c.bf16 %v360_v25, %v357_v24  ;;  %v3037_v33 = vpack.c.bf16 %v367_v27, %v364_v26  ;;  %v373_v38 = vld [vmem:[#allocation4 + $0xe0] sm:$0xff] }
  0x1c   :  { %2286 = vmatpush1.bf16.msra.mxu0 %v3006_v15  ;;  %173 = vmatprep.mubr.f32.mxu0 %v2928_v0  ;;  %v49_v30 = vld [vmem:[%s3508_s1 + $0x10] sm:$0xff]  ;;  %v2279_v32 = vpack.c.bf16 %v60_v29, %v57_v28  ;;  %v366_v35 = vld [vmem:[#allocation4 + $0xa8] sm:$0xff]  ;;  %v50_v41 = vld [vmem:[%s3508_s1 + $0x18] sm:$0xff] }
  0x1d   :  { %2288 = vmatprep.subr.bf16.mxu0 %v3009_v16  ;;  %v363_v34 = vld [vmem:[#allocation4 + $0x90] sm:$0xff]  ;;  %v370_v37 = vld [vmem:[#allocation4 + $0xc8] sm:$0xff]  ;;  %v353_v43 = vld [vmem:[#allocation4 + $0x40] sm:$0xff] }
  0x1e   :  { %v347_v36 = vld [vmem:[#allocation4 + $0x10] sm:$0xff]  ;;  %2280 = vmatprep.subr.bf16.mxu1 %v2279_v32  ;;  %v350_v39 = vld [vmem:[#allocation4 + $0x28] sm:$0xff]  ;;  %v3047_v42 = vpack.c.bf16 %v366_v35, %v363_v34  ;;  %v356_v44 = vld [vmem:[#allocation4 + $0x58] sm:$0xff]  ;;  %v3050_v45 = vpack.c.bf16 %v373_v38, %v370_v37 }
  0x1f   :  { %1801 = vmatmul.mubr.msk.f32.gmra.mrb[2].mxu0 %vm78_vm0, %v48_v21  ;;  %2282 = vmatpush3.bf16.msra.mxu1 %v2279_v32  ;;  %v3040_v40 = vpack.c.bf16 %v350_v39, %v347_v36  ;;  %v369_v46 = vld [vmem:[#allocation4 + $0xc0] sm:$0xff]  ;;  %v372_v47 = vld [vmem:[#allocation4 + $0xd8] sm:$0xff]  ;;  %v379_v50 = vld [vmem:[#allocation4 + $0x110] sm:$0xff]  ;;  %v3056_v51 = vpack.c.bf16 %v356_v44, %v353_v43  ;;  %v63_v36 = vlaneseq }
  0x20   :  { %2290 = vmatpush1.bf16.msra.mxu0 %v3017_v22  ;;  %179 = vmatprep.mubr.f32.mxu0 %v2928_v0  ;;  %v376_v49 = vld [vmem:[#allocation4 + $0xf8] sm:$0xff]  ;;  %v51_v52 = vld [vmem:[%s3508_s1 + $0x20] sm:$0xff]  ;;  %v3063_v53 = vpack.c.bf16 %v372_v47, %v369_v46  ;;  %v359_v54 = vld [vmem:[#allocation4 + $0x70] sm:$0xff] }
  0x21   :  { %2292 = vmatprep.subr.bf16.mxu0 %v3020_v23  ;;  %2315 = vmatprep.subr.bf16.mxu1 %v2929_v48  ;;  %v362_v55 = vld [vmem:[#allocation4 + $0x88] sm:$0xff]  ;;  %v3066_v56 = vpack.c.bf16 %v379_v50, %v376_v49  ;;  %v375_v57 = vld [vmem:[#allocation4 + $0xf0] sm:$0xff]  ;;  %v385_v60 = vld [vmem:[#allocation4 + $0x140] sm:$0xff]  ;;  %v64_v37 = vshrl.u32 %v63_v36, 7 }
  0x22   :  { %1984 = vmatmul.mubr.msk.f32.vlgmr.msra.gmra.mrb[0].mxu1 %vm78_vm0, %v48_v21  ;;  %v378_v58 = vld [vmem:[#allocation4 + $0x108] sm:$0xff]  ;;  %v3072_v61 = vpack.c.bf16 %v362_v55, %v359_v54  ;;  %v365_v1 = vld [vmem:[#allocation4 + $0xa0] sm:$0xff]  ;;  %v368_v2 = vld [vmem:[#allocation4 + $0xb8] sm:$0xff] }
  0x23   :  { %1802 = vmatmul.mubr.msk.f32.gmra.mrb[4].mxu0 %vm78_vm0, %v49_v30  ;;  %2317 = vmatpush3.bf16.msra.mxu1 %v3040_v40  ;;  %v382_v59 = vld [vmem:[#allocation4 + $0x128] sm:$0xff]  ;;  %v3079_v63 = vpack.c.bf16 %v378_v58, %v375_v57  ;;  %v381_v4 = vld [vmem:[#allocation4 + $0x120] sm:$0xff]  ;;  %v384_v5 = vld [vmem:[#allocation4 + $0x138] sm:$0xff]  ;;  %v3088_v8 = vpack.c.bf16 %v368_v2, %v365_v1  ;;  %v73_v38 = vsub.s32 2, %v64_v37  ;;  %v65_v54 = vsub.s32 0, %v64_v37 }
  0x24   :  { %2294 = vmatpush1.bf16.msra.mxu0 %v3034_v31  ;;  %185 = vmatprep.mubr.f32.mxu0 %v2928_v0  ;;  %v52_v62 = vld [vmem:[%s3508_s1 + $0x28] sm:$0xff]  ;;  %v3082_v3 = vpack.c.bf16 %v385_v60, %v382_v59  ;;  %v388_v6 = vld [vmem:[#allocation4 + $0x158] sm:$0xff]  ;;  %v391_v7 = vld [vmem:[#allocation4 + $0x170] sm:$0xff]  ;;  %v3095_v10 = vpack.c.bf16 %v384_v5, %v381_v4 }
  0x25   :  { %2296 = vmatprep.subr.bf16.mxu0 %v3037_v33  ;;  %2318 = vmatprep.subr.bf16.mxu1 %v2929_v48  ;;  %v53_v9 = vld [vmem:[%s3508_s1 + $0x30] sm:$0xff]  ;;  %v374_v13 = vld [vmem:[#allocation4 + $0xe8] sm:$0xff]  ;;  %v3098_v14 = vpack.c.bf16 %v391_v7, %v388_v6  ;;  %v54_v20 = vld [vmem:[%s3508_s1 + $0x38] sm:$0xff]  ;;  %v69_v6 = vsub.s32 1, %v64_v37 }
  0x26   :  { %1986 = vmatprep.mubr.msk.f32.mxu1 %vm78_vm0, %v49_v30  ;;  %v371_v11 = vld [vmem:[#allocation4 + $0xd0] sm:$0xff]  ;;  %v390_v18 = vld [vmem:[#allocation4 + $0x168] sm:$0xff]  ;;  %v377_v24 = vld [vmem:[#allocation4 + $0x100] sm:$0xff] }
  0x27   :  { %1803 = vmatmul.mubr.msk.f32.gmra.mrb[6].mxu0 %vm78_vm0, %v50_v41  ;;  %2320 = vmatpush3.bf16.msra.mxu1 %v3056_v51  ;;  %v387_v17 = vld [vmem:[#allocation4 + $0x150] sm:$0xff]  ;;  %v3104_v19 = vpack.c.bf16 %v374_v13, %v371_v11  ;;  %v380_v25 = vld [vmem:[#allocation4 + $0x118] sm:$0xff]  ;;  %v3125_v27 = vld [vmem:[%s3507_s0] sm:$0xff] }
  0x28   :  { %2298 = vmatpush1.bf16.msra.mxu0 %v3047_v42  ;;  %191 = vmatprep.mubr.f32.mxu0 %v2928_v0  ;;  %v3111_v21 = vpack.c.bf16 %v390_v18, %v387_v17  ;;  %v3118_v26 = vpack.c.bf16 %v380_v25, %v377_v24  ;;  %v383_v28 = vld [vmem:[#allocation4 + $0x130] sm:$0xff]  ;;  %v386_v29 = vld [vmem:[#allocation4 + $0x148] sm:$0xff]  ;;  %v389_v32 = vld [vmem:[#allocation4 + $0x160] sm:$0xff] }
  0x29   :  { %2300 = vmatprep.subr.bf16.mxu0 %v3050_v45  ;;  %2321 = vmatprep.subr.bf16.mxu1 %v2929_v48  ;;  %v3133_v30 = vpack.c.bf16 %v386_v29, %v383_v28  ;;  %v392_v34 = vld [vmem:[#allocation4 + $0x178] sm:$0xff]  ;;  %v61_v39 = vld [vmem:[%s3511_s4] sm:$0x7] }
  0x2a   :  { %1987 = vmatmul.mubr.msk.f32.gmra.mrb[2].mxu1 %vm78_vm0, %v50_v41  ;;  %v3142_v35 = vpack.c.bf16 %v392_v34, %v389_v32  ;;  %v74_v41 = vrot.slane %v61_v39, %v73_v38  ;;  %v3191_v59 = vrot.slane %v61_v39, %v65_v54  ;;  %v3200_v13 = vrot.slane %v61_v39, %v69_v6  ;;  %v3206_v29 = vld [vmem:[%s3512_s5] ss:$0 sm:$0xff]  ;;  %s2931_s5 = smov [#allocation7]  }
  0x2b   :  { %1804 = vmatmul.mubr.msk.f32.gmra.mrb[8].mxu0 %vm78_vm0, %v51_v52  ;;  %2323 = vmatpush3.bf16.msra.mxu1 %v3072_v61  ;;  %s1767_s21 = sshll.u32 %s2931_s5, 4  ;;  %s1768_s21 = int_to_ptr.vmem [resolvable:$true] %s1767_s21 }
  0x2c   :  { %2302 = vmatpush1.bf16.msra.mxu0 %v3063_v53  ;;  %197 = vmatprep.mubr.f32.mxu0 %v2928_v0  ;;  %s2875_s23 = scalar_lea.vmem %s1768_s21, 1024  ;;  %p2880_p9 = scmp.lt.s32.totalorder %s1768_s21, %s1768_s21 }
  0x2d   :  { %2304 = vmatprep.subr.bf16.mxu0 %v3066_v56  ;;  %2324 = vmatprep.subr.bf16.mxu1 %v2929_v48  ;;  %p2876_p8 = scmp.ne.s32.totalorder %s1768_s21, %s2875_s23  ;;  %p2881_p10 = scmp.lt.s32.totalorder %s2875_s23, %s2875_s23 }
  0x2e   :  { %1989 = vmatprep.mubr.msk.f32.mxu1 %vm78_vm0, %v51_v52 }
  0x2f   :  { %1805 = vmatmul.mubr.msk.f32.gmra.mrb[10].mxu0 %vm78_vm0, %v52_v62  ;;  %2326 = vmatpush3.bf16.msra.mxu1 %v3088_v8  ;;  %p2882_p11 = por %p2881_p10, %p2880_p9 }
  0x30   :  { %2306 = vmatpush1.bf16.msra.mxu0 %v3079_v63  ;;  %203 = vmatprep.mubr.f32.mxu0 %v2928_v0 }
  0x31   :  { %2308 = vmatprep.subr.bf16.mxu0 %v3082_v3  ;;  %2327 = vmatprep.subr.bf16.mxu1 %v2929_v48  ;;  %p2883_p12 = pnand %p2882_p11, %p2876_p8 }
  0x32   :  { %1990 = vmatmul.mubr.msk.f32.gmra.mrb[4].mxu1 %vm78_vm0, %v52_v62 }
  0x33   :  { %1806 = vmatmul.mubr.msk.f32.gmra.mrb[12].mxu0 %vm78_vm0, %v53_v9  ;;  %2329 = vmatpush3.bf16.msra.mxu1 %v3104_v19 }
  0x34   :  { %2310 = vmatpush1.bf16.msra.mxu0 %v3095_v10  ;;  %209 = vmatprep.mubr.f32.mxu0 %v2928_v0 }
  0x35   :  { %2312 = vmatprep.subr.bf16.mxu0 %v3098_v14  ;;  %2330 = vmatprep.subr.bf16.mxu1 %v2929_v48 }
  0x36   :  { %1992 = vmatprep.mubr.msk.f32.mxu1 %vm78_vm0, %v53_v9 }
  0x37   :  { %1807 = vmatmul.mubr.msk.f32.gmra.mrb[14].mxu0 %vm78_vm0, %v54_v20  ;;  %1993 = vmatmul.mubr.msk.f32.gmra.mrb[6].mxu1 %vm78_vm0, %v54_v20 }
  0x38   :  { %2314 = vmatpush1.bf16.msra.mxu0 %v3111_v21  ;;  %465 = vmatprep.mubr.f32.mxu0 %v2928_v0 }
  0x39   :  { %2340 = vmatprep.subr.bf16.mxu0 %v3004_v12  ;;  %2332 = vmatpush3.bf16.msra.mxu1 %v3118_v26 }
  0x3a   :  { %2333 = vmatprep.subr.bf16.mxu1 %v2929_v48  ;;  %2027 = vmatprep.mubr.msk.f32.mxu1 %vm2930_vm1, %v2928_v0 }
  0x3b   :  { %466 = vmatmul.mubr.f32.vlgmr.msra.gmra.mrb[0].mxu0 %v3125_v27 }
  0x3c   :  { %2342 = vmatpush1.bf16.msra.mxu0 %v3006_v15  ;;  %640 = vmatprep.mubr.f32.mxu0 %v2928_v0 }
  0x3d   :  { %2344 = vmatprep.subr.bf16.mxu0 %v3009_v16  ;;  %2335 = vmatpush3.bf16.msra.mxu1 %v3133_v30 }
  0x3e   :  { %2336 = vmatprep.subr.bf16.mxu1 %v2929_v48 }
  0x40   :  { %2346 = vmatpush1.bf16.msra.mxu0 %v3017_v22 }
  0x41   :  { %2348 = vmatprep.subr.bf16.mxu0 %v3020_v23  ;;  %2338 = vmatpush3.bf16.msra.mxu1 %v3142_v35 }
  0x42   :  { %2371 = vmatprep.subr.bf16.mxu1 %v2929_v48 }
  0x44   :  { %2350 = vmatpush1.bf16.msra.mxu0 %v3034_v31  ;;  %2028 = vmatmul.mubr.f32.vlgmr.msra.gmra.mrb[8].mxu1 %v3125_v27 }
  0x45   :  { %2352 = vmatprep.subr.bf16.mxu0 %v3037_v33  ;;  %2373 = vmatpush3.bf16.msra.mxu1 %v3040_v40 }
  0x46   :  { %2062 = vmatprep.mubr.msk.f32.mxu1 %vm2930_vm1, %v2928_v0  ;;  %2374 = vmatprep.subr.bf16.mxu1 %v2929_v48 }
  0x48   :  { %2354 = vmatpush1.bf16.msra.mxu0 %v3047_v42 }
  0x49   :  { %2356 = vmatprep.subr.bf16.mxu0 %v3050_v45  ;;  %2376 = vmatpush3.bf16.msra.mxu1 %v3056_v51 }
  0x4a   :  { %2377 = vmatprep.subr.bf16.mxu1 %v2929_v48 }
  0x4c   :  { %2358 = vmatpush1.bf16.msra.mxu0 %v3063_v53 }
  0x4d   :  { %2360 = vmatprep.subr.bf16.mxu0 %v3066_v56  ;;  %2379 = vmatpush3.bf16.msra.mxu1 %v3072_v61 }
  0x4e   :  { %2380 = vmatprep.subr.bf16.mxu1 %v2929_v48 }
  0x50   :  { %2362 = vmatpush1.bf16.msra.mxu0 %v3079_v63 }
  0x51   :  { %2364 = vmatprep.subr.bf16.mxu0 %v3082_v3  ;;  %2382 = vmatpush3.bf16.msra.mxu1 %v3088_v8 }
  0x52   :  { %2383 = vmatprep.subr.bf16.mxu1 %v2929_v48 }
  0x54   :  { %2366 = vmatpush1.bf16.msra.mxu0 %v3095_v10 }
  0x55   :  { %2368 = vmatprep.subr.bf16.mxu0 %v3098_v14  ;;  %2385 = vmatpush3.bf16.msra.mxu1 %v3104_v19 }
  0x56   :  { %2386 = vmatprep.subr.bf16.mxu1 %v2929_v48 }
  0x58   :  { %2370 = vmatpush1.bf16.msra.mxu0 %v3111_v21 }
  0x59   :  { %2396 = vmatprep.subr.bf16.mxu0 %v3004_v12  ;;  %2388 = vmatpush3.bf16.msra.mxu1 %v3118_v26 }
  0x5a   :  { %2389 = vmatprep.subr.bf16.mxu1 %v2929_v48 }
  0x5d   :  { %2391 = vmatpush3.bf16.msra.mxu1 %v3133_v30 }
  0x5e   :  { %2392 = vmatprep.subr.bf16.mxu1 %v2929_v48 }
  0x61   :  { %2394 = vmatpush3.bf16.msra.mxu1 %v3142_v35 }
  0x62   :  { %2427 = vmatprep.subr.bf16.mxu1 %v2929_v48 }
  0xf5   :  { %v1985_v43 = vpop.f32.mrb[0].mxu1 }
  0xf6   :  { %v3183_v44 = vadd.f32 %v1985_v43, %v74_v41  ;;  %v282_v46 = vpop.f32.mrb[1].mxu1 }
  0xf7   :  { %v283_v37 = vadd.f32 %v282_v46, %v74_v41 }
  0xfd   :  { %v1988_v47 = vpop.f32.mrb[2].mxu1 }
  0xfe   :  { %v3185_v49 = vadd.f32 %v1988_v47, %v74_v41  ;;  %v292_v50 = vpop.f32.mrb[3].mxu1 }
  0xff   :  { %v3187_v52 = vadd.f32 %v292_v50, %v74_v41 }
 0x105   :  { %v1991_v55 = vpop.f32.mrb[4].mxu1 }
 0x106   :  { %v3189_v57 = vadd.f32 %v1991_v55, %v74_v41  ;;  %v302_v58 = vpop.f32.mrb[5].mxu1 }
 0x107   :  { %v3193_v60 = vadd.f32 %v302_v58, %v74_v41 }
 0x10a   :  { %v1994_v62 = vpop.f32.mrb[6].mxu1 }
 0x10b   :  { %v3195_v2 = vadd.f32 %v1994_v62, %v74_v41  ;;  %v312_v4 = vpop.f32.mrb[7].mxu1 }
 0x10c   :  { %v3198_v9 = vadd.f32 %v312_v4, %v74_v41 }
 0x10e   :  { %v467_v1 = vpop.f32.mrb[0].mxu0 }
 0x10f   :  { %v2731_v5 = vadd.f32 %v467_v1, %v3191_v59  ;;  %v469_v7 = vpop.f32.mrb[1].mxu0 }
 0x110   :  { %v2732_v17 = vadd.f32 %v469_v7, %v3200_v13 }
 0x111   :  { %v1816_v11 = vmul.f32 -1.442695, %v2731_v5 }
 0x112   :  { %v1817_v24 = vmul.f32 -1.442695, %v2732_v17 }
 0x113   :  { %2773 = vpow2.f32 %v1816_v11 }
 0x114   :  { %2775 = vpow2.f32 %v1817_v24 }
 0x117   :  { %v538_v18 = vpop.f32.mrb[8].mxu1 }
 0x118   :  { %v2029_v20 = vpop.f32.mrb[9].mxu1  ;;  %v562_v32 = vadd.f32 %v3206_v29, %v538_v18 }
 0x11d   :  { %v2774_v25 = vpop.eup %2773 }
 0x11e   :  { %v546_v28 = vadd.f32 1.0, %v2774_v25  ;;  %v2776_v34 = vpop.eup %2775 }
 0x11f   :  { %v553_v39 = vadd.f32 1.0, %v2776_v34 }
 0x120   :  { %2777 = vrcp.f32 %v546_v28 }
 0x12a   :  { %v2778_v36 = vpop.eup %2777 }
 0x12b   :  { %v563_v38 = vmul.f32 %v2778_v36, %v562_v32 }
 0x12d   :  { %v564_v43 = vadd.f32 %v563_v38, %v283_v37 }
 0x12f   :  { %2779 = vtanh.f32 %v564_v43 }
 0x130   :  { %2781 = vrcp.f32 %v553_v39 }
 0x139   :  { %v2780_v47 = vpop.eup %2779 }
 0x13a   :  { %v566_v50 = vsub.f32 %v3125_v27, %v2780_v47  ;;  %v2782_v54 = vpop.eup %2781 }
 0x13c   :  { %v567_v55 = vmul.f32 %v2782_v54, %v566_v50 }
 0x13e   :  { %v3210_v58 = vadd.f32 %v2780_v47, %v567_v55 }
 0x140   :  { %569 = vst [vmem:[#allocation7] sm:$0xff] %v3210_v58  ;;  %641 = vmatmul.mubr.f32.vlgmr.msra.gmra.mrb[2].mxu0 %v3210_v58  ;;  %2063 = vmatmul.mubr.f32.vlgmr.msra.gmra.mrb[10].mxu1 %v3210_v58 }
 0x141   :  { %2398 = vmatpush1.bf16.msra.mxu0 %v3006_v15  ;;  %2429 = vmatpush3.bf16.msra.mxu1 %v3040_v40 }
 0x142   :  { %2400 = vmatprep.subr.bf16.mxu0 %v3009_v16  ;;  %2430 = vmatprep.subr.bf16.mxu1 %v2929_v48 }
 0x143   :  { %810 = vmatprep.mubr.f32.mxu0 %v2928_v0  ;;  %2097 = vmatprep.mubr.msk.f32.mxu1 %vm2930_vm1, %v2928_v0 }
 0x145   :  { %2402 = vmatpush1.bf16.msra.mxu0 %v3017_v22  ;;  %2432 = vmatpush3.bf16.msra.mxu1 %v3056_v51 }
 0x146   :  { %2404 = vmatprep.subr.bf16.mxu0 %v3020_v23  ;;  %2433 = vmatprep.subr.bf16.mxu1 %v2929_v48 }
 0x149   :  { %2406 = vmatpush1.bf16.msra.mxu0 %v3034_v31  ;;  %2435 = vmatpush3.bf16.msra.mxu1 %v3072_v61 }
 0x14a   :  { %2408 = vmatprep.subr.bf16.mxu0 %v3037_v33  ;;  %2436 = vmatprep.subr.bf16.mxu1 %v2929_v48 }
 0x14d   :  { %2410 = vmatpush1.bf16.msra.mxu0 %v3047_v42  ;;  %2438 = vmatpush3.bf16.msra.mxu1 %v3088_v8 }
 0x14e   :  { %2412 = vmatprep.subr.bf16.mxu0 %v3050_v45  ;;  %2439 = vmatprep.subr.bf16.mxu1 %v2929_v48 }
 0x151   :  { %2414 = vmatpush1.bf16.msra.mxu0 %v3063_v53  ;;  %2441 = vmatpush3.bf16.msra.mxu1 %v3104_v19 }
 0x152   :  { %2416 = vmatprep.subr.bf16.mxu0 %v3066_v56  ;;  %2442 = vmatprep.subr.bf16.mxu1 %v2929_v48 }
 0x155   :  { %2418 = vmatpush1.bf16.msra.mxu0 %v3079_v63  ;;  %2444 = vmatpush3.bf16.msra.mxu1 %v3118_v26 }
 0x156   :  { %2420 = vmatprep.subr.bf16.mxu0 %v3082_v3  ;;  %2445 = vmatprep.subr.bf16.mxu1 %v2929_v48 }
 0x159   :  { %2422 = vmatpush1.bf16.msra.mxu0 %v3095_v10  ;;  %2447 = vmatpush3.bf16.msra.mxu1 %v3133_v30 }
 0x15a   :  { %2424 = vmatprep.subr.bf16.mxu0 %v3098_v14  ;;  %2448 = vmatprep.subr.bf16.mxu1 %v2929_v48 }
 0x15d   :  { %2426 = vmatpush1.bf16.msra.mxu0 %v3111_v21  ;;  %2450 = vmatpush3.bf16.msra.mxu1 %v3142_v35 }
 0x15e   :  { %2452 = vmatprep.subr.bf16.mxu0 %v3004_v12  ;;  %2483 = vmatprep.subr.bf16.mxu1 %v2929_v48 }
 0x213   :  { %v642_v27 = vpop.f32.mrb[2].mxu0  ;;  %v713_v41 = vpop.f32.mrb[10].mxu1 }
 0x214   :  { %v2733_v46 = vadd.f32 %v642_v27, %v3191_v59  ;;  %v644_v62 = vpop.f32.mrb[3].mxu0  ;;  %v2064_v1 = vpop.f32.mrb[11].mxu1  ;;  %v731_v18 = vadd.f32 %v3206_v29, %v713_v41 }
 0x215   :  { %v2734_v5 = vadd.f32 %v644_v62, %v3200_v13 }
 0x216   :  { %v1819_v4 = vmul.f32 -1.442695, %v2733_v46 }
 0x217   :  { %v1820_v6 = vmul.f32 -1.442695, %v2734_v5 }
 0x218   :  { %2783 = vpow2.f32 %v1819_v4 }
 0x219   :  { %2785 = vpow2.f32 %v1820_v6 }
 0x222   :  { %v2784_v7 = vpop.eup %2783 }
 0x223   :  { %v721_v11 = vadd.f32 1.0, %v2784_v7  ;;  %v2786_v17 = vpop.eup %2785 }
 0x224   :  { %v728_v28 = vadd.f32 1.0, %v2786_v17 }
 0x225   :  { %2787 = vrcp.f32 %v721_v11 }
 0x22f   :  { %v2788_v20 = vpop.eup %2787 }
 0x230   :  { %v732_v24 = vmul.f32 %v2788_v20, %v731_v18 }
 0x232   :  { %v733_v25 = vadd.f32 %v732_v24, %v3183_v44 }
 0x234   :  { %2789 = vtanh.f32 %v733_v25 }
 0x235   :  { %2791 = vrcp.f32 %v728_v28 }
 0x23e   :  { %v2790_v32 = vpop.eup %2789 }
 0x23f   :  { %v735_v34 = vsub.f32 %v3210_v58, %v2790_v32  ;;  %v2792_v36 = vpop.eup %2791 }
 0x241   :  { %v736_v37 = vmul.f32 %v2792_v36, %v735_v34 }
 0x243   :  { %v3255_v38 = vadd.f32 %v2790_v32, %v736_v37 }
 0x245   :  { %739 = vst [vmem:[#allocation7 + $0x8] sm:$0xff] %v3255_v38  ;;  %811 = vmatmul.mubr.f32.vlgmr.msra.gmra.mrb[4].mxu0 %v3255_v38  ;;  %2098 = vmatmul.mubr.f32.vlgmr.msra.gmra.mrb[12].mxu1 %v3255_v38 }
 0x246   :  { %2454 = vmatpush1.bf16.msra.mxu0 %v3006_v15  ;;  %2485 = vmatpush3.bf16.msra.mxu1 %v3040_v40 }
 0x247   :  { %2456 = vmatprep.subr.bf16.mxu0 %v3009_v16  ;;  %2486 = vmatprep.subr.bf16.mxu1 %v2929_v48 }
 0x248   :  { %980 = vmatprep.mubr.f32.mxu0 %v2928_v0  ;;  %2132 = vmatprep.mubr.msk.f32.mxu1 %vm2930_vm1, %v2928_v0 }
 0x24a   :  { %2458 = vmatpush1.bf16.msra.mxu0 %v3017_v22  ;;  %2488 = vmatpush3.bf16.msra.mxu1 %v3056_v51 }
 0x24b   :  { %2460 = vmatprep.subr.bf16.mxu0 %v3020_v23  ;;  %2489 = vmatprep.subr.bf16.mxu1 %v2929_v48 }
 0x24e   :  { %2462 = vmatpush1.bf16.msra.mxu0 %v3034_v31  ;;  %2491 = vmatpush3.bf16.msra.mxu1 %v3072_v61 }
 0x24f   :  { %2464 = vmatprep.subr.bf16.mxu0 %v3037_v33  ;;  %2492 = vmatprep.subr.bf16.mxu1 %v2929_v48 }
 0x252   :  { %2466 = vmatpush1.bf16.msra.mxu0 %v3047_v42  ;;  %2494 = vmatpush3.bf16.msra.mxu1 %v3088_v8 }
 0x253   :  { %2468 = vmatprep.subr.bf16.mxu0 %v3050_v45  ;;  %2495 = vmatprep.subr.bf16.mxu1 %v2929_v48 }
 0x256   :  { %2470 = vmatpush1.bf16.msra.mxu0 %v3063_v53  ;;  %2497 = vmatpush3.bf16.msra.mxu1 %v3104_v19 }
 0x257   :  { %2472 = vmatprep.subr.bf16.mxu0 %v3066_v56  ;;  %2498 = vmatprep.subr.bf16.mxu1 %v2929_v48 }
 0x25a   :  { %2474 = vmatpush1.bf16.msra.mxu0 %v3079_v63  ;;  %2500 = vmatpush3.bf16.msra.mxu1 %v3118_v26 }
 0x25b   :  { %2476 = vmatprep.subr.bf16.mxu0 %v3082_v3  ;;  %2501 = vmatprep.subr.bf16.mxu1 %v2929_v48 }
 0x25e   :  { %2478 = vmatpush1.bf16.msra.mxu0 %v3095_v10  ;;  %2503 = vmatpush3.bf16.msra.mxu1 %v3133_v30 }
 0x25f   :  { %2480 = vmatprep.subr.bf16.mxu0 %v3098_v14  ;;  %2504 = vmatprep.subr.bf16.mxu1 %v2929_v48 }
 0x262   :  { %2482 = vmatpush1.bf16.msra.mxu0 %v3111_v21  ;;  %2506 = vmatpush3.bf16.msra.mxu1 %v3142_v35 }
 0x263   :  { %2508 = vmatprep.subr.bf16.mxu0 %v3004_v12  ;;  %2539 = vmatprep.subr.bf16.mxu1 %v2929_v48 }
 0x318   :  { %v812_v44 = vpop.f32.mrb[4].mxu0  ;;  %v883_v39 = vpop.f32.mrb[12].mxu1 }
 0x319   :  { %v2735_v43 = vadd.f32 %v812_v44, %v3191_v59  ;;  %v814_v47 = vpop.f32.mrb[5].mxu0  ;;  %v2099_v50 = vpop.f32.mrb[13].mxu1  ;;  %v901_v62 = vadd.f32 %v3206_v29, %v883_v39 }
 0x31a   :  { %v2736_v55 = vadd.f32 %v814_v47, %v3200_v13 }
 0x31b   :  { %v1821_v54 = vmul.f32 -1.442695, %v2735_v43 }
 0x31c   :  { %v1822_v58 = vmul.f32 -1.442695, %v2736_v55 }
 0x31d   :  { %2793 = vpow2.f32 %v1821_v54 }
 0x31e   :  { %2795 = vpow2.f32 %v1822_v58 }
 0x327   :  { %v2794_v27 = vpop.eup %2793 }
 0x328   :  { %v891_v41 = vadd.f32 1.0, %v2794_v27  ;;  %v2796_v46 = vpop.eup %2795 }
 0x329   :  { %v898_v6 = vadd.f32 1.0, %v2796_v46 }
 0x32a   :  { %2797 = vrcp.f32 %v891_v41 }
 0x334   :  { %v2798_v1 = vpop.eup %2797 }
 0x335   :  { %v902_v4 = vmul.f32 %v2798_v1, %v901_v62 }
 0x337   :  { %v903_v5 = vadd.f32 %v902_v4, %v3187_v52 }
 0x339   :  { %2799 = vtanh.f32 %v903_v5 }
 0x33a   :  { %2801 = vrcp.f32 %v898_v6 }
 0x343   :  { %v2800_v7 = vpop.eup %2799 }
 0x344   :  { %v905_v11 = vsub.f32 %v3255_v38, %v2800_v7  ;;  %v2802_v17 = vpop.eup %2801 }
 0x346   :  { %v906_v18 = vmul.f32 %v2802_v17, %v905_v11 }
 0x348   :  { %v3300_v20 = vadd.f32 %v2800_v7, %v906_v18 }
 0x34a   :  { %909 = vst [vmem:[#allocation7 + $0x10] sm:$0xff] %v3300_v20  ;;  %981 = vmatmul.mubr.f32.vlgmr.msra.gmra.mrb[6].mxu0 %v3300_v20  ;;  %2133 = vmatmul.mubr.f32.vlgmr.msra.gmra.mrb[14].mxu1 %v3300_v20 }
 0x34b   :  { %2510 = vmatpush1.bf16.msra.mxu0 %v3006_v15  ;;  %2541 = vmatpush3.bf16.msra.mxu1 %v3040_v40 }
 0x34c   :  { %2512 = vmatprep.subr.bf16.mxu0 %v3009_v16  ;;  %2542 = vmatprep.subr.bf16.mxu1 %v2929_v48 }
 0x34d   :  { %1150 = vmatprep.mubr.f32.mxu0 %v2928_v0  ;;  %2167 = vmatprep.mubr.msk.f32.mxu1 %vm2930_vm1, %v2928_v0 }
 0x34f   :  { %2514 = vmatpush1.bf16.msra.mxu0 %v3017_v22  ;;  %2544 = vmatpush3.bf16.msra.mxu1 %v3056_v51 }
 0x350   :  { %2516 = vmatprep.subr.bf16.mxu0 %v3020_v23  ;;  %2545 = vmatprep.subr.bf16.mxu1 %v2929_v48 }
 0x353   :  { %2518 = vmatpush1.bf16.msra.mxu0 %v3034_v31  ;;  %2547 = vmatpush3.bf16.msra.mxu1 %v3072_v61 }
 0x354   :  { %2520 = vmatprep.subr.bf16.mxu0 %v3037_v33  ;;  %2548 = vmatprep.subr.bf16.mxu1 %v2929_v48 }
 0x357   :  { %2522 = vmatpush1.bf16.msra.mxu0 %v3047_v42  ;;  %2550 = vmatpush3.bf16.msra.mxu1 %v3088_v8 }
 0x358   :  { %2524 = vmatprep.subr.bf16.mxu0 %v3050_v45  ;;  %2551 = vmatprep.subr.bf16.mxu1 %v2929_v48 }
 0x35b   :  { %2526 = vmatpush1.bf16.msra.mxu0 %v3063_v53  ;;  %2553 = vmatpush3.bf16.msra.mxu1 %v3104_v19 }
 0x35c   :  { %2528 = vmatprep.subr.bf16.mxu0 %v3066_v56  ;;  %2554 = vmatprep.subr.bf16.mxu1 %v2929_v48 }
 0x35f   :  { %2530 = vmatpush1.bf16.msra.mxu0 %v3079_v63  ;;  %2556 = vmatpush3.bf16.msra.mxu1 %v3118_v26 }
 0x360   :  { %2532 = vmatprep.subr.bf16.mxu0 %v3082_v3  ;;  %2557 = vmatprep.subr.bf16.mxu1 %v2929_v48 }
 0x363   :  { %2534 = vmatpush1.bf16.msra.mxu0 %v3095_v10  ;;  %2559 = vmatpush3.bf16.msra.mxu1 %v3133_v30 }
 0x364   :  { %2536 = vmatprep.subr.bf16.mxu0 %v3098_v14  ;;  %2560 = vmatprep.subr.bf16.mxu1 %v2929_v48 }
 0x367   :  { %2538 = vmatpush1.bf16.msra.mxu0 %v3111_v21  ;;  %2562 = vmatpush3.bf16.msra.mxu1 %v3142_v35 }
 0x368   :  { %2564 = vmatprep.subr.bf16.mxu0 %v3004_v12  ;;  %2595 = vmatprep.subr.bf16.mxu1 %v2929_v48 }
 0x41d   :  { %v982_v52 = vpop.f32.mrb[6].mxu0  ;;  %v1053_v24 = vpop.f32.mrb[14].mxu1 }
 0x41e   :  { %v2737_v25 = vadd.f32 %v982_v52, %v3191_v59  ;;  %v984_v28 = vpop.f32.mrb[7].mxu0  ;;  %v2134_v32 = vpop.f32.mrb[15].mxu1  ;;  %v1071_v43 = vadd.f32 %v3206_v29, %v1053_v24 }
 0x41f   :  { %v2738_v36 = vadd.f32 %v984_v28, %v3200_v13 }
 0x420   :  { %v1823_v34 = vmul.f32 -1.442695, %v2737_v25 }
 0x421   :  { %v1824_v37 = vmul.f32 -1.442695, %v2738_v36 }
 0x422   :  { %2803 = vpow2.f32 %v1823_v34 }
 0x423   :  { %2805 = vpow2.f32 %v1824_v37 }
 0x42c   :  { %v2804_v38 = vpop.eup %2803 }
 0x42d   :  { %v1061_v44 = vadd.f32 1.0, %v2804_v38  ;;  %v2806_v39 = vpop.eup %2805 }
 0x42e   :  { %v1068_v55 = vadd.f32 1.0, %v2806_v39 }
 0x42f   :  { %2807 = vrcp.f32 %v1061_v44 }
 0x439   :  { %v2808_v47 = vpop.eup %2807 }
 0x43a   :  { %v1072_v50 = vmul.f32 %v2808_v47, %v1071_v43 }
 0x43c   :  { %v1073_v54 = vadd.f32 %v1072_v50, %v3185_v49 }
 0x43e   :  { %2809 = vtanh.f32 %v1073_v54 }
 0x43f   :  { %2811 = vrcp.f32 %v1068_v55 }
 0x448   :  { %v2810_v58 = vpop.eup %2809 }
 0x449   :  { %v1075_v27 = vsub.f32 %v3300_v20, %v2810_v58  ;;  %v2812_v41 = vpop.eup %2811 }
 0x44b   :  { %v1076_v46 = vmul.f32 %v2812_v41, %v1075_v27 }
 0x44d   :  { %v3345_v62 = vadd.f32 %v2810_v58, %v1076_v46 }
 0x44f   :  { %1079 = vst [vmem:[#allocation7 + $0x18] sm:$0xff] %v3345_v62  ;;  %1151 = vmatmul.mubr.f32.vlgmr.msra.gmra.mrb[8].mxu0 %v3345_v62  ;;  %2168 = vmatmul.mubr.f32.vlgmr.msra.gmra.mrb[16].mxu1 %v3345_v62 }
 0x450   :  { %2566 = vmatpush1.bf16.msra.mxu0 %v3006_v15  ;;  %2597 = vmatpush3.bf16.msra.mxu1 %v3040_v40 }
 0x451   :  { %2568 = vmatprep.subr.bf16.mxu0 %v3009_v16  ;;  %2598 = vmatprep.subr.bf16.mxu1 %v2929_v48 }
 0x452   :  { %1320 = vmatprep.mubr.f32.mxu0 %v2928_v0  ;;  %2202 = vmatprep.mubr.msk.f32.mxu1 %vm2930_vm1, %v2928_v0 }
 0x454   :  { %2570 = vmatpush1.bf16.msra.mxu0 %v3017_v22  ;;  %2600 = vmatpush3.bf16.msra.mxu1 %v3056_v51 }
 0x455   :  { %2572 = vmatprep.subr.bf16.mxu0 %v3020_v23  ;;  %2601 = vmatprep.subr.bf16.mxu1 %v2929_v48 }
 0x458   :  { %2574 = vmatpush1.bf16.msra.mxu0 %v3034_v31  ;;  %2603 = vmatpush3.bf16.msra.mxu1 %v3072_v61 }
 0x459   :  { %2576 = vmatprep.subr.bf16.mxu0 %v3037_v33  ;;  %2604 = vmatprep.subr.bf16.mxu1 %v2929_v48 }
 0x45c   :  { %2578 = vmatpush1.bf16.msra.mxu0 %v3047_v42  ;;  %2606 = vmatpush3.bf16.msra.mxu1 %v3088_v8 }
 0x45d   :  { %2580 = vmatprep.subr.bf16.mxu0 %v3050_v45  ;;  %2607 = vmatprep.subr.bf16.mxu1 %v2929_v48 }
 0x460   :  { %2582 = vmatpush1.bf16.msra.mxu0 %v3063_v53  ;;  %2609 = vmatpush3.bf16.msra.mxu1 %v3104_v19 }
 0x461   :  { %2584 = vmatprep.subr.bf16.mxu0 %v3066_v56  ;;  %2610 = vmatprep.subr.bf16.mxu1 %v2929_v48 }
 0x464   :  { %2586 = vmatpush1.bf16.msra.mxu0 %v3079_v63  ;;  %2612 = vmatpush3.bf16.msra.mxu1 %v3118_v26 }
 0x465   :  { %2588 = vmatprep.subr.bf16.mxu0 %v3082_v3  ;;  %2613 = vmatprep.subr.bf16.mxu1 %v2929_v48 }
 0x468   :  { %2590 = vmatpush1.bf16.msra.mxu0 %v3095_v10  ;;  %2615 = vmatpush3.bf16.msra.mxu1 %v3133_v30 }
 0x469   :  { %2592 = vmatprep.subr.bf16.mxu0 %v3098_v14  ;;  %2616 = vmatprep.subr.bf16.mxu1 %v2929_v48 }
 0x46c   :  { %2594 = vmatpush1.bf16.msra.mxu0 %v3111_v21  ;;  %2618 = vmatpush3.bf16.msra.mxu1 %v3142_v35 }
 0x46d   :  { %2620 = vmatprep.subr.bf16.mxu0 %v3004_v12  ;;  %2651 = vmatprep.subr.bf16.mxu1 %v2929_v48 }
 0x522   :  { %v1152_v49 = vpop.f32.mrb[8].mxu0  ;;  %v1223_v1 = vpop.f32.mrb[16].mxu1 }
 0x523   :  { %v2739_v4 = vadd.f32 %v1152_v49, %v3191_v59  ;;  %v1154_v5 = vpop.f32.mrb[9].mxu0  ;;  %v2169_v6 = vpop.f32.mrb[17].mxu1  ;;  %v1241_v24 = vadd.f32 %v3206_v29, %v1223_v1 }
 0x524   :  { %v2740_v11 = vadd.f32 %v1154_v5, %v3200_v13 }
 0x525   :  { %v1825_v7 = vmul.f32 -1.442695, %v2739_v4 }
 0x526   :  { %v1826_v17 = vmul.f32 -1.442695, %v2740_v11 }
 0x527   :  { %2813 = vpow2.f32 %v1825_v7 }
 0x528   :  { %2815 = vpow2.f32 %v1826_v17 }
 0x531   :  { %v2814_v18 = vpop.eup %2813 }
 0x532   :  { %v1231_v20 = vadd.f32 1.0, %v2814_v18  ;;  %v2816_v52 = vpop.eup %2815 }
 0x533   :  { %v1238_v34 = vadd.f32 1.0, %v2816_v52 }
 0x534   :  { %2817 = vrcp.f32 %v1231_v20 }
 0x53e   :  { %v2818_v25 = vpop.eup %2817 }
 0x53f   :  { %v1242_v28 = vmul.f32 %v2818_v25, %v1241_v24 }
 0x541   :  { %v1243_v32 = vadd.f32 %v1242_v28, %v3193_v60 }
 0x543   :  { %2819 = vtanh.f32 %v1243_v32 }
 0x544   :  { %2821 = vrcp.f32 %v1238_v34 }
 0x54d   :  { %v2820_v36 = vpop.eup %2819 }
 0x54e   :  { %v1245_v37 = vsub.f32 %v3345_v62, %v2820_v36  ;;  %v2822_v38 = vpop.eup %2821 }
 0x550   :  { %v1246_v44 = vmul.f32 %v2822_v38, %v1245_v37 }
 0x552   :  { %v3390_v39 = vadd.f32 %v2820_v36, %v1246_v44 }
 0x554   :  { %1249 = vst [vmem:[#allocation7 + $0x20] sm:$0xff] %v3390_v39  ;;  %1321 = vmatmul.mubr.f32.vlgmr.msra.gmra.mrb[10].mxu0 %v3390_v39  ;;  %2203 = vmatmul.mubr.f32.vlgmr.msra.gmra.mrb[18].mxu1 %v3390_v39 }
 0x555   :  { %2622 = vmatpush1.bf16.msra.mxu0 %v3006_v15  ;;  %2653 = vmatpush3.bf16.msra.mxu1 %v3040_v40 }
 0x556   :  { %2624 = vmatprep.subr.bf16.mxu0 %v3009_v16  ;;  %2654 = vmatprep.subr.bf16.mxu1 %v2929_v48 }
 0x557   :  { %1490 = vmatprep.mubr.f32.mxu0 %v2928_v0  ;;  %2237 = vmatprep.mubr.msk.f32.mxu1 %vm2930_vm1, %v2928_v0 }
 0x559   :  { %2626 = vmatpush1.bf16.msra.mxu0 %v3017_v22  ;;  %2656 = vmatpush3.bf16.msra.mxu1 %v3056_v51 }
 0x55a   :  { %2628 = vmatprep.subr.bf16.mxu0 %v3020_v23  ;;  %2657 = vmatprep.subr.bf16.mxu1 %v2929_v48 }
 0x55d   :  { %2630 = vmatpush1.bf16.msra.mxu0 %v3034_v31  ;;  %2659 = vmatpush3.bf16.msra.mxu1 %v3072_v61 }
 0x55e   :  { %2632 = vmatprep.subr.bf16.mxu0 %v3037_v33  ;;  %2660 = vmatprep.subr.bf16.mxu1 %v2929_v48 }
 0x561   :  { %2634 = vmatpush1.bf16.msra.mxu0 %v3047_v42  ;;  %2662 = vmatpush3.bf16.msra.mxu1 %v3088_v8 }
 0x562   :  { %2636 = vmatprep.subr.bf16.mxu0 %v3050_v45  ;;  %2663 = vmatprep.subr.bf16.mxu1 %v2929_v48 }
 0x565   :  { %2638 = vmatpush1.bf16.msra.mxu0 %v3063_v53  ;;  %2665 = vmatpush3.bf16.msra.mxu1 %v3104_v19 }
 0x566   :  { %2640 = vmatprep.subr.bf16.mxu0 %v3066_v56  ;;  %2666 = vmatprep.subr.bf16.mxu1 %v2929_v48 }
 0x569   :  { %2642 = vmatpush1.bf16.msra.mxu0 %v3079_v63  ;;  %2668 = vmatpush3.bf16.msra.mxu1 %v3118_v26 }
 0x56a   :  { %2644 = vmatprep.subr.bf16.mxu0 %v3082_v3  ;;  %2669 = vmatprep.subr.bf16.mxu1 %v2929_v48 }
 0x56d   :  { %2646 = vmatpush1.bf16.msra.mxu0 %v3095_v10  ;;  %2671 = vmatpush3.bf16.msra.mxu1 %v3133_v30 }
 0x56e   :  { %2648 = vmatprep.subr.bf16.mxu0 %v3098_v14  ;;  %2672 = vmatprep.subr.bf16.mxu1 %v2929_v48 }
 0x571   :  { %2650 = vmatpush1.bf16.msra.mxu0 %v3111_v21  ;;  %2674 = vmatpush3.bf16.msra.mxu1 %v3142_v35 }
 0x572   :  { %2676 = vmatprep.subr.bf16.mxu0 %v3004_v12  ;;  %2707 = vmatprep.subr.bf16.mxu1 %v2929_v48 }
 0x627   :  { %v1322_v60 = vpop.f32.mrb[10].mxu0  ;;  %v1393_v43 = vpop.f32.mrb[18].mxu1 }
 0x628   :  { %v2741_v47 = vadd.f32 %v1322_v60, %v3191_v59  ;;  %v1324_v50 = vpop.f32.mrb[11].mxu0  ;;  %v2204_v54 = vpop.f32.mrb[19].mxu1  ;;  %v1411_v12 = vadd.f32 %v3206_v29, %v1393_v43 }
 0x629   :  { %v2742_v58 = vadd.f32 %v1324_v50, %v3200_v13 }
 0x62a   :  { %v1827_v55 = vmul.f32 -1.442695, %v2741_v47 }
 0x62b   :  { %v1828_v27 = vmul.f32 -1.442695, %v2742_v58 }
 0x62c   :  { %2823 = vpow2.f32 %v1827_v55 }
 0x62d   :  { %2825 = vpow2.f32 %v1828_v27 }
 0x636   :  { %v2824_v41 = vpop.eup %2823 }
 0x637   :  { %v1401_v46 = vadd.f32 1.0, %v2824_v41  ;;  %v2826_v62 = vpop.eup %2825 }
 0x638   :  { %v1408_v5 = vadd.f32 1.0, %v2826_v62 }
 0x639   :  { %2827 = vrcp.f32 %v1401_v46 }
 0x643   :  { %v2828_v49 = vpop.eup %2827 }
 0x644   :  { %v1412_v1 = vmul.f32 %v2828_v49, %v1411_v12 }
 0x646   :  { %v1413_v4 = vadd.f32 %v1412_v1, %v3189_v57 }
 0x648   :  { %2829 = vtanh.f32 %v1413_v4 }
 0x649   :  { %2831 = vrcp.f32 %v1408_v5 }
 0x652   :  { %v2830_v6 = vpop.eup %2829 }
 0x653   :  { %v1415_v7 = vsub.f32 %v3390_v39, %v2830_v6  ;;  %v2832_v11 = vpop.eup %2831 }
 0x655   :  { %v1416_v17 = vmul.f32 %v2832_v11, %v1415_v7 }
 0x657   :  { %v1417_v18 = vadd.f32 %v2830_v6, %v1416_v17 }
 0x659   :  { %1419 = vst [vmem:[#allocation7 + $0x28] sm:$0xff] %v1417_v18  ;;  %1491 = vmatmul.mubr.f32.vlgmr.msra.gmra.mrb[12].mxu0 %v1417_v18  ;;  %2238 = vmatmul.mubr.f32.vlgmr.msra.gmra.mrb[20].mxu1 %v1417_v18 }
 0x65a   :  { %2678 = vmatpush1.bf16.msra.mxu0 %v3006_v15  ;;  %2709 = vmatpush3.bf16.msra.mxu1 %v3040_v40 }
 0x65b   :  { %2680 = vmatprep.subr.bf16.mxu0 %v3009_v16  ;;  %2710 = vmatprep.subr.bf16.mxu1 %v2929_v48 }
 0x65c   :  { %1660 = vmatprep.mubr.f32.mxu0 %v2928_v0  ;;  %2272 = vmatprep.mubr.msk.f32.mxu1 %vm2930_vm1, %v2928_v0 }
 0x65e   :  { %2682 = vmatpush1.bf16.msra.mxu0 %v3017_v22  ;;  %2712 = vmatpush3.bf16.msra.mxu1 %v3056_v51 }
 0x65f   :  { %2684 = vmatprep.subr.bf16.mxu0 %v3020_v23  ;;  %2713 = vmatprep.subr.bf16.mxu1 %v2929_v48 }
 0x662   :  { %2686 = vmatpush1.bf16.msra.mxu0 %v3034_v31  ;;  %2715 = vmatpush3.bf16.msra.mxu1 %v3072_v61 }
 0x663   :  { %2688 = vmatprep.subr.bf16.mxu0 %v3037_v33  ;;  %2716 = vmatprep.subr.bf16.mxu1 %v2929_v48 }
 0x666   :  { %2690 = vmatpush1.bf16.msra.mxu0 %v3047_v42  ;;  %2718 = vmatpush3.bf16.msra.mxu1 %v3088_v8 }
 0x667   :  { %2692 = vmatprep.subr.bf16.mxu0 %v3050_v45  ;;  %2719 = vmatprep.subr.bf16.mxu1 %v2929_v48 }
 0x66a   :  { %2694 = vmatpush1.bf16.msra.mxu0 %v3063_v53  ;;  %2721 = vmatpush3.bf16.msra.mxu1 %v3104_v19 }
 0x66b   :  { %2696 = vmatprep.subr.bf16.mxu0 %v3066_v56  ;;  %2722 = vmatprep.subr.bf16.mxu1 %v2929_v48 }
 0x66e   :  { %2698 = vmatpush1.bf16.msra.mxu0 %v3079_v63  ;;  %2724 = vmatpush3.bf16.msra.mxu1 %v3118_v26 }
 0x66f   :  { %2700 = vmatprep.subr.bf16.mxu0 %v3082_v3  ;;  %2725 = vmatprep.subr.bf16.mxu1 %v2929_v48 }
 0x672   :  { %2702 = vmatpush1.bf16.msra.mxu0 %v3095_v10  ;;  %2727 = vmatpush3.bf16.msra.mxu1 %v3133_v30 }
 0x673   :  { %2704 = vmatprep.subr.bf16.mxu0 %v3098_v14  ;;  %2728 = vmatprep.subr.bf16.mxu1 %v2929_v48 }
 0x676   :  { %2706 = vmatpush1.bf16.msra.mxu0 %v3111_v21  ;;  %2730 = vmatpush3.bf16.msra.mxu1 %v3142_v35 }
 0x72c   :  { %v1492_v0 = vpop.f32.mrb[12].mxu0  ;;  %v1563_v15 = vpop.f32.mrb[20].mxu1 }
 0x72d   :  { %v2743_v16 = vadd.f32 %v1492_v0, %v3191_v59  ;;  %v1494_v22 = vpop.f32.mrb[13].mxu0  ;;  %v2239_v23 = vpop.f32.mrb[21].mxu1  ;;  %v1581_v51 = vadd.f32 %v3206_v29, %v1563_v15 }
 0x72e   :  { %v2744_v33 = vadd.f32 %v1494_v22, %v3200_v13 }
 0x72f   :  { %v1829_v31 = vmul.f32 -1.442695, %v2743_v16 }
 0x730   :  { %v1830_v40 = vmul.f32 -1.442695, %v2744_v33 }
 0x731   :  { %2833 = vpow2.f32 %v1829_v31 }
 0x732   :  { %2835 = vpow2.f32 %v1830_v40 }
 0x73b   :  { %v2834_v42 = vpop.eup %2833 }
 0x73c   :  { %v1571_v45 = vadd.f32 1.0, %v2834_v42  ;;  %v2836_v48 = vpop.eup %2835 }
 0x73d   :  { %v1578_v63 = vadd.f32 1.0, %v2836_v48 }
 0x73e   :  { %2837 = vrcp.f32 %v1571_v45 }
 0x748   :  { %v2838_v53 = vpop.eup %2837 }
 0x749   :  { %v1582_v56 = vmul.f32 %v2838_v53, %v1581_v51 }
 0x74b   :  { %v1583_v61 = vadd.f32 %v1582_v56, %v3198_v9 }
 0x74d   :  { %2839 = vtanh.f32 %v1583_v61 }
 0x74e   :  { %2841 = vrcp.f32 %v1578_v63 }
 0x757   :  { %v2840_v3 = vpop.eup %2839 }
 0x758   :  { %v1585_v8 = vsub.f32 %v1417_v18, %v2840_v3  ;;  %v2842_v10 = vpop.eup %2841 }
 0x75a   :  { %v1586_v14 = vmul.f32 %v2842_v10, %v1585_v8 }
 0x75c   :  { %v1587_v19 = vadd.f32 %v2840_v3, %v1586_v14 }
 0x75e   :  { %1589 = vst [vmem:[#allocation7 + $0x30] sm:$0xff] %v1587_v19  ;;  %1661 = vmatmul.mubr.f32.vlgmr.msra.gmra.mrb[14].mxu0 %v1587_v19  ;;  %2273 = vmatmul.mubr.f32.vlgmr.msra.gmra.mrb[22].mxu1 %v1587_v19 }
 0x831   :  { %v1662_v21 = vpop.f32.mrb[14].mxu0  ;;  %v1733_v26 = vpop.f32.mrb[22].mxu1 }
 0x832   :  { %v2745_v30 = vadd.f32 %v1662_v21, %v3191_v59  ;;  %v1664_v35 = vpop.f32.mrb[15].mxu0  ;;  %v2274_v57 = vpop.f32.mrb[23].mxu1  ;;  %v1751_v32 = vadd.f32 %v3206_v29, %v1733_v26 }
 0x833   :  { %v2746_v9 = vadd.f32 %v1664_v35, %v3200_v13 }
 0x834   :  { %v1831_v20 = vmul.f32 -1.442695, %v2745_v30 }
 0x835   :  { %v1832_v52 = vmul.f32 -1.442695, %v2746_v9 }
 0x836   :  { %2843 = vpow2.f32 %v1831_v20 }
 0x837   :  { %2845 = vpow2.f32 %v1832_v52 }
 0x840   :  { %v2844_v24 = vpop.eup %2843 }
 0x841   :  { %v1741_v25 = vadd.f32 1.0, %v2844_v24  ;;  %v2846_v28 = vpop.eup %2845 }
 0x842   :  { %v1748_v38 = vadd.f32 1.0, %v2846_v28 }
 0x843   :  { %2847 = vrcp.f32 %v1741_v25 }
 0x84d   :  { %v2848_v34 = vpop.eup %2847 }
 0x84e   :  { %v1752_v36 = vmul.f32 %v2848_v34, %v1751_v32 }
 0x850   :  { %v1753_v37 = vadd.f32 %v1752_v36, %v3195_v2 }
 0x852   :  { %2849 = vtanh.f32 %v1753_v37 }
 0x853   :  { %2851 = vrcp.f32 %v1748_v38 }
 0x85c   :  { %v2850_v59 = vpop.eup %2849 }
 0x85d   :  { %v1755_v44 = vsub.f32 %v1587_v19, %v2850_v59  ;;  %v2852_v13 = vpop.eup %2851 }
 0x85f   :  { %v1756_v39 = vmul.f32 %v2852_v13, %v1755_v44 }
 0x861   :  { %v1757_v60 = vadd.f32 %v2850_v59, %v1756_v39 }
 0x863   :  { %1759 = vst [vmem:[#allocation7 + $0x38] sm:$0xff] %v1757_v60  ;;  %1761 = vst [vmem:[#allocation8] sm:$0xff] %v1757_v60 }
 0x864   :  { %2886 = shalt.err (!%p2883_p12)
}
 0x865   :  { %s2887_s26 = scalar_lea.hbm %s3513_s6, 1024 }
 0x866   :  { %p2888_p13 = scmp.ne.s32.totalorder %s3513_s6, %s2887_s26  ;;  %p2891_p0 = scmp.lt.u32.totalorder %s2887_s26, %s3513_s6 }
 0x868   :  { %p2893_p1 = pnand %p2891_p0, %p2888_p13 }
 0x86a   :  { %2896 = shalt.err (!%p2893_p1)
}
 0x86b   :  { %s2933_s8 = smov 128   ;;  %s2934_s2 = smov 8  }
 0x86c   :  { %1773 = dma.vmem_to_hbm [thread:$0]  %s1768_s21, 1024, %s3513_s6, [#allocation6], %s2933_s8, %s2933_s8, %s2934_s2  }
 0x86d   :  { %s2897_s11 = scalar_lea.vmem %s3476_s22, 128  ;;  %p2902_p3 = scmp.lt.s32.totalorder %s3476_s22, %s3476_s22 }
 0x86e   :  { %p2898_p2 = scmp.ne.s32.totalorder %s3476_s22, %s2897_s11  ;;  %p2903_p4 = scmp.lt.s32.totalorder %s2897_s11, %s2897_s11 }
 0x870   :  { %p2904_p5 = por %p2903_p4, %p2902_p3 }
 0x872   :  { %p2905_p6 = pnand %p2904_p5, %p2898_p2 }
 0x874   :  { %2908 = shalt.err (!%p2905_p6)
}
 0x875   :  { %s2909_s14 = scalar_lea.hbm %s3514_s7, 128 }
 0x876   :  { %p2910_p7 = scmp.ne.s32.totalorder %s3514_s7, %s2909_s14  ;;  %p2913_p8 = scmp.lt.u32.totalorder %s2909_s14, %s3514_s7 }
 0x878   :  { %p2915_p9 = pnand %p2913_p8, %p2910_p7 }
 0x87a   :  { %2918 = shalt.err (!%p2915_p9)
}
 0x87b   :  { %1783 = dma.vmem_to_hbm [thread:$0]  %s3476_s22, 128, %s3514_s7, [#allocation9]  }
 0x87c   :  { %2921 = dma.done.wait [#allocation6], 1024  }
 0x87d   :  { %2922 = vsyncadd [#allocation6], 4294966272 }
 0x87e   :  { %2923 = dma.done.wait [#allocation9], 128  }
 0x87f   :  { %2924 = vsyncadd [#allocation9], 4294967168 }
 0x880   :  { %1790 = vsyncpa [#allocation5], 1 }
 0x881   :  { %1791 = vsyncpa [#allocation6], 1 }
 0x882   :  { %1792 = vsyncpa [#allocation9], 1 }

</bundles_post_ra>
